<compile_context>
chip_gen: v5e
topology: v5e:2x2
jax: 0.10.0
libtpu: 0.0.40
codegen_flags: <defaults>
</compile_context>

<pallas_src>
import jax
import jax.numpy as jnp
from jax.experimental import pallas as pl
from jax.experimental.pallas import tpu as pltpu


# ----------------------------------------------------------------------------
# Helpers
# ----------------------------------------------------------------------------
def _round_up(n, m):
    return ((n + m - 1) // m) * m


def _largest_aligned_divisor(n, align, cap):
    """Largest divisor of `n` that is a multiple of `align` and <= `cap`.

    Falls back to `n` itself (a full-extent block is always legal)."""
    if n % align != 0:
        return n
    best = n
    for d in range(align, min(n, cap) + 1, align):
        if n % d == 0:
            best = d
    return best


def _im2col_3x3_same(x_nchw):
    """NCHW -> im2col patches [B, H*W, 9*C]; K axis ordered as (kh, kw, c).

    Built from NHWC slab concatenation: only the small input is transposed
    once; the 9x-expanded patch tensor is produced already lane-dense."""
    B, C, H, W = x_nchw.shape
    x = jnp.transpose(x_nchw, (0, 2, 3, 1))                     # NHWC, once
    xp = jnp.pad(x, ((0, 0), (1, 1), (1, 1), (0, 0)))
    slabs = [xp[:, di:di + H, dj:dj + W, :]
             for di in range(3) for dj in range(3)]             # 9 x [B,H,W,C]
    patches = jnp.concatenate(slabs, axis=-1)                   # [B,H,W,9C]
    return patches.reshape(B, H * W, 9 * C)


# ----------------------------------------------------------------------------
# Fused forward: conv(im2col matmul) + ReLU + GAP + fc + softmax
# ----------------------------------------------------------------------------
def ldl_model_forward(x_nchw, params, *, max_hw_tile=2048):
    """Full LDLModel forward. x_nchw: [B, C, H, W] f32 -> [B, num_classes]."""
    B, C, H, W = x_nchw.shape
    w_conv = params["w_conv"]                   # [F, C, 3, 3]  (PyTorch layout)
    b_conv = params["b_conv"]                   # [F]
    w_fc = params["w_fc"]                       # [num_classes, F]
    b_fc = params["b_fc"]                       # [num_classes]

    F = w_conv.shape[0]
    num_classes = w_fc.shape[0]
    HW = H * W
    K = C * 9

    ALIGN = 16                                  # bf16 sublane packing
    Bt = 8                                      # batch rows per program
    Bp = _round_up(B, Bt)
    HWp = _round_up(HW, ALIGN)
    n_pad_hw = HWp - HW                         # zero patch rows, corrected exactly

    K8 = _round_up(K, 8)                        # sublane multiple only (NOT 128)
    Fp = _round_up(F, 256) if F > 128 else 128  # 256-wide N for v6e/v7x MXU
    Cp = _round_up(num_classes, 128)

    # Spatial tile budget: keep the double-buffered patch block under ~8 MiB so
    # the whole pipeline fits every generation's scoped-VMEM default (v7x incl).
    k_lane = _round_up(K8, 128)                 # VMEM lane padding of the K axis
    cap = max(ALIGN, (8 * 1024 * 1024) // (Bt * k_lane * 2 * 2))
    hw_tile = _largest_aligned_divisor(HWp, ALIGN, min(cap, max_hw_tile))
    n_t = HWp // hw_tile
    # ~256-row matmul/epilogue chunks keep the f32 intermediate in vregs.
    hw_chunk = _largest_aligned_divisor(hw_tile, ALIGN, max(ALIGN, 256 // Bt))
    n_chunks = hw_tile // hw_chunk
    inv_hw = 1.0 / float(HW)

    # ---- host-side operand prep (bf16 MXU operands, lane-dense) -------------
    patches = _im2col_3x3_same(x_nchw.astype(jnp.bfloat16))     # [B, HW, K] bf16
    patches = jnp.pad(patches, ((0, Bp - B), (0, HWp - HW), (0, K8 - K)))

    # Conv weight -> [K, F] with K ordered (kh, kw, c) to match im2col.
    wc = jnp.transpose(w_conv, (2, 3, 1, 0)).reshape(K, F)
    wc = jnp.pad(wc, ((0, K8 - K), (0, Fp - F))).astype(jnp.bfloat16)
    bc = jnp.pad(b_conv, (0, Fp - F)).reshape(1, Fp).astype(jnp.float32)

    # fc weight -> [F, num_classes]; padded class columns get -1e30 bias so
    # their softmax contribution is exactly zero (epilogue stays f32).
    wf = jnp.pad(w_fc.T,
                 ((0, Fp - F), (0, Cp - num_classes))).astype(jnp.bfloat16)
    bf = jnp.full((1, Cp), -1e30, jnp.float32).at[0, :num_classes].set(
        b_fc.astype(jnp.float32))

    def fused_kernel(patch_ref, wc_ref, bc_ref, wf_ref, bf_ref,
                     out_ref, acc_ref):
        t = pl.program_id(1)

        @pl.when(t == 0)
        def _init():
            acc_ref[...] = jnp.zeros_like(acc_ref)

        wc_v = wc_ref[...]                      # (K8, Fp) bf16
        bias = bc_ref[...]                      # (1, Fp) f32

        # Conv as im2col matmul (bf16 MXU, f32 acc) + bias + ReLU + GAP partial
        # sums, chunked so the f32 intermediate stays register-resident.
        for c in range(n_chunks):               # small static unroll
            lo = c * hw_chunk
            pc = patch_ref[:, lo:lo + hw_chunk, :]              # (Bt, hw_chunk, K8)
            pc = pc.reshape(Bt * hw_chunk, K8)                  # sublane-aligned merge
            yc = jnp.dot(pc, wc_v, preferred_element_type=jnp.float32)
            yc = jnp.maximum(yc + bias, 0.0)                    # (Bt*hw_chunk, Fp) f32
            # Sublane-phase partial sums: plain VPU vreg adds; the single
            # cross-sublane reduce is deferred to the finalize branch.
            acc_ref[...] += yc.reshape(Bt, hw_chunk // 8, 8, Fp).sum(axis=1)

        @pl.when(t == pl.num_programs(1) - 1)
        def _finalize():
            gap = jnp.sum(acc_ref[...], axis=1)                 # (Bt, Fp), one XLU reduce
            if n_pad_hw:
                # Each zero-padded spatial row contributed exactly relu(b_conv).
                gap = gap - float(n_pad_hw) * jnp.maximum(bias, 0.0)
            feat = (gap * inv_hw).astype(jnp.bfloat16)          # GAP mean, (Bt, Fp)
            logits = jnp.dot(feat, wf_ref[...],
                             preferred_element_type=jnp.float32) + bf_ref[...]
            m = jnp.max(logits, axis=1, keepdims=True)
            e = jnp.exp(logits - m)
            out_ref[...] = e / jnp.sum(e, axis=1, keepdims=True)  # exact softmax

    probs_padded = pl.pallas_call(
        fused_kernel,
        out_shape=jax.ShapeDtypeStruct((Bp, Cp), jnp.float32),
        grid_spec=pltpu.PrefetchScalarGridSpec(
            num_scalar_prefetch=0,
            grid=(Bp // Bt, n_t),               # batch parallel, HW reduction last
            in_specs=[
                pl.BlockSpec((Bt, hw_tile, K8), lambda b, t: (b, t, 0)),
                pl.BlockSpec((K8, Fp), lambda b, t: (0, 0)),
                pl.BlockSpec((1, Fp), lambda b, t: (0, 0)),
                pl.BlockSpec((Fp, Cp), lambda b, t: (0, 0)),
                pl.BlockSpec((1, Cp), lambda b, t: (0, 0)),
            ],
            out_specs=pl.BlockSpec((Bt, Cp), lambda b, t: (b, 0)),
            scratch_shapes=[pltpu.VMEM((Bt, 8, Fp), jnp.float32)],
        ),
        compiler_params=pltpu.CompilerParams(
            dimension_semantics=("parallel", "arbitrary")),
    )(patches, wc, bc, wf, bf)

    return probs_padded[:B, :num_classes]


# ----------------------------------------------------------------------------
# Pure-JAX reference (f32) and parameter init
# ----------------------------------------------------------------------------
def _reference_forward(x_nchw, params):
    B, C, H, W = x_nchw.shape
    w_conv, b_conv = params["w_conv"], params["b_conv"]
    w_fc, b_fc = params["w_fc"], params["b_fc"]
    F = w_conv.shape[0]
    patches = _im2col_3x3_same(x_nchw)                          # [B, HW, 9C] f32
    wc = jnp.transpose(w_conv, (2, 3, 1, 0)).reshape(C * 9, F)
    y = jnp.maximum(jnp.einsum("bpk,kf->bpf", patches, wc) + b_conv, 0.0)
    feats = jnp.mean(y, axis=1)                                 # GAP -> [B, F]
    logits = feats @ w_fc.T + b_fc
    return jax.nn.softmax(logits, axis=1)


def init_params(key, in_channels, num_features, num_classes):
    k1, k2, k3, k4 = jax.random.split(key, 4)
    fan_conv = in_channels * 9
    w_conv = jax.random.normal(k1, (num_features, in_channels, 3, 3),
                               jnp.float32) * (1.0 / fan_conv) ** 0.5
    b_conv = jax.random.normal(k2, (num_features,), jnp.float32) * 0.01
    w_fc = jax.random.normal(k3, (num_classes, num_features),
                             jnp.float32) * (1.0 / num_features) ** 0.5
    b_fc = jax.random.normal(k4, (num_classes,), jnp.float32) * 0.01
    return {"w_conv": w_conv, "b_conv": b_conv, "w_fc": w_fc, "b_fc": b_fc}


if __name__ == "__main__":
    key = jax.random.PRNGKey(0)
    B, C, H, W = 2, 4, 16, 16          # NCHW input, PyTorch convention
    num_features = 32                  # backbone feature dim (= fc.in_features)
    num_classes = 8

    kx, kp = jax.random.split(key)
    x = jax.random.normal(kx, (B, C, H, W), jnp.float32)
    params = init_params(kp, C, num_features, num_classes)

    fwd = jax.jit(ldl_model_forward)
    probs = jax.block_until_ready(fwd(x, params))

    # sanity: shape, exact softmax normalization, match f32 reference
    assert probs.shape == (B, num_classes)
    assert jnp.allclose(jnp.sum(probs, axis=1), 1.0, atol=1e-5)
    ref = _reference_forward(x, params)
    assert jnp.allclose(probs, ref, atol=2e-2, rtol=2e-2)
    print("KERNEL_OK")
</pallas_src>

<mosaic_0001>
module attributes {stable_mosaic.version = 11 : i64} {
  func.func @fused_kernel(%arg0: i32, %arg1: i32, %arg2: memref<8x256x40xbf16, #tpu.memory_space<vmem>>, %arg3: memref<40x128xbf16, #tpu.memory_space<vmem>>, %arg4: memref<1x128xf32, #tpu.memory_space<vmem>>, %arg5: memref<128x128xbf16, #tpu.memory_space<vmem>>, %arg6: memref<1x128xf32, #tpu.memory_space<vmem>>, %arg7: memref<8x128xf32, #tpu.memory_space<vmem>>, %arg8: memref<8x8x128xf32, #tpu.memory_space<vmem>>) attributes {dimension_semantics = [#tpu.dimension_semantics<parallel>, #tpu.dimension_semantics<arbitrary>], iteration_bounds = array<i64: 1, 1>, scalar_prefetch = 0 : i64, scratch_operands = 1 : i64, tpu.core_type = #tpu.core_type<tc>, window_params = [{transform_indices = @transform_0, window_bounds = array<i64: 8, 256, 40>}, {pipeline_mode = #tpu.pipeline_mode<synchronous>, transform_indices = @transform_1, window_bounds = array<i64: 40, 128>}, {pipeline_mode = #tpu.pipeline_mode<synchronous>, transform_indices = @transform_2, window_bounds = array<i64: 1, 128>}, {pipeline_mode = #tpu.pipeline_mode<synchronous>, transform_indices = @transform_3, window_bounds = array<i64: 128, 128>}, {pipeline_mode = #tpu.pipeline_mode<synchronous>, transform_indices = @transform_4, window_bounds = array<i64: 1, 128>}, {transform_indices = @transform_5, window_bounds = array<i64: 8, 128>}]} {
    %c0_i32 = arith.constant 0 : i32
    %0 = arith.cmpi eq, %arg1, %c0_i32 : i32
    %1 = arith.extui %0 : i1 to i32
    %c0_i32_0 = arith.constant 0 : i32
    %2 = arith.cmpi ne, %1, %c0_i32_0 : i32
    scf.if %2 {
      %cst_94 = arith.constant 0.000000e+00 : f32
      %104 = vector.broadcast %cst_94 : f32 to vector<8x8x128xf32>
      %c0_95 = arith.constant 0 : index
      %c0_96 = arith.constant 0 : index
      %c0_97 = arith.constant 0 : index
      %105 = vector.load %arg8[%c0_95, %c0_96, %c0_97] : memref<8x8x128xf32, #tpu.memory_space<vmem>>, vector<8x8x128xf32>
      tpu.vector_store %arg8[%c0_95, %c0_96, %c0_97], %104 {strides = array<i32>} : memref<8x8x128xf32, #tpu.memory_space<vmem>>, vector<8x8x128xf32>,
    } else {
    }
    %c0 = arith.constant 0 : index
    %c0_1 = arith.constant 0 : index
    %3 = vector.load %arg3[%c0, %c0_1] : memref<40x128xbf16, #tpu.memory_space<vmem>>, vector<40x128xbf16>
    %c0_2 = arith.constant 0 : index
    %c0_3 = arith.constant 0 : index
    %4 = vector.load %arg4[%c0_2, %c0_3] : memref<1x128xf32, #tpu.memory_space<vmem>>, vector<1x128xf32>
    %c0_4 = arith.constant 0 : index
    %c0_5 = arith.constant 0 : index
    %c0_6 = arith.constant 0 : index
    %5 = vector.load %arg2[%c0_4, %c0_5, %c0_6] : memref<8x256x40xbf16, #tpu.memory_space<vmem>>, vector<8x32x40xbf16>
    %6 = vector.shape_cast %5 : vector<8x32x40xbf16> to vector<256x40xbf16>
    %cst = arith.constant dense<0.000000e+00> : vector<256x128xf32>
    %7 = tpu.matmul %6, %3, %cst {dimension_numbers = #tpu.dot_dimension_numbers<[1], [0], [0], [1], [0, 0, 1, 1], [], []>} : vector<256x40xbf16>, vector<40x128xbf16>, vector<256x128xf32> -> vector<256x128xf32>
    %8 = vector.broadcast %4 : vector<1x128xf32> to vector<256x128xf32>
    %9 = arith.addf %7, %8 : vector<256x128xf32>
    %cst_7 = arith.constant 0.000000e+00 : f32
    %10 = vector.broadcast %cst_7 : f32 to vector<256x128xf32>
    %11 = arith.maximumf %9, %10 : vector<256x128xf32>
    %c0_8 = arith.constant 0 : index
    %c0_9 = arith.constant 0 : index
    %c0_10 = arith.constant 0 : index
    %12 = vector.load %arg8[%c0_8, %c0_9, %c0_10] : memref<8x8x128xf32, #tpu.memory_space<vmem>>, vector<8x8x128xf32>
    %13 = vector.shape_cast %11 : vector<256x128xf32> to vector<8x4x8x128xf32>
    %cst_11 = arith.constant dense<0.000000e+00> : vector<8x8x128xf32>
    %14 = vector.multi_reduction <add>, %13, %cst_11 [1] : vector<8x4x8x128xf32> to vector<8x8x128xf32>
    %15 = arith.addf %12, %14 : vector<8x8x128xf32>
    %c0_12 = arith.constant 0 : index
    %c0_13 = arith.constant 0 : index
    %c0_14 = arith.constant 0 : index
    %16 = vector.load %arg8[%c0_12, %c0_13, %c0_14] : memref<8x8x128xf32, #tpu.memory_space<vmem>>, vector<8x8x128xf32>
    tpu.vector_store %arg8[%c0_12, %c0_13, %c0_14], %15 {strides = array<i32>} : memref<8x8x128xf32, #tpu.memory_space<vmem>>, vector<8x8x128xf32>,
    %c0_15 = arith.constant 0 : index
    %c32 = arith.constant 32 : index
    %c0_16 = arith.constant 0 : index
    %17 = vector.load %arg2[%c0_15, %c32, %c0_16] : memref<8x256x40xbf16, #tpu.memory_space<vmem>>, vector<8x32x40xbf16>
    %18 = vector.shape_cast %17 : vector<8x32x40xbf16> to vector<256x40xbf16>
    %cst_17 = arith.constant dense<0.000000e+00> : vector<256x128xf32>
    %19 = tpu.matmul %18, %3, %cst_17 {dimension_numbers = #tpu.dot_dimension_numbers<[1], [0], [0], [1], [0, 0, 1, 1], [], []>} : vector<256x40xbf16>, vector<40x128xbf16>, vector<256x128xf32> -> vector<256x128xf32>
    %20 = vector.broadcast %4 : vector<1x128xf32> to vector<256x128xf32>
    %21 = arith.addf %19, %20 : vector<256x128xf32>
    %cst_18 = arith.constant 0.000000e+00 : f32
    %22 = vector.broadcast %cst_18 : f32 to vector<256x128xf32>
    %23 = arith.maximumf %21, %22 : vector<256x128xf32>
    %c0_19 = arith.constant 0 : index
    %c0_20 = arith.constant 0 : index
    %c0_21 = arith.constant 0 : index
    %24 = vector.load %arg8[%c0_19, %c0_20, %c0_21] : memref<8x8x128xf32, #tpu.memory_space<vmem>>, vector<8x8x128xf32>
    %25 = vector.shape_cast %23 : vector<256x128xf32> to vector<8x4x8x128xf32>
    %cst_22 = arith.constant dense<0.000000e+00> : vector<8x8x128xf32>
    %26 = vector.multi_reduction <add>, %25, %cst_22 [1] : vector<8x4x8x128xf32> to vector<8x8x128xf32>
    %27 = arith.addf %24, %26 : vector<8x8x128xf32>
    %c0_23 = arith.constant 0 : index
    %c0_24 = arith.constant 0 : index
    %c0_25 = arith.constant 0 : index
    %28 = vector.load %arg8[%c0_23, %c0_24, %c0_25] : memref<8x8x128xf32, #tpu.memory_space<vmem>>, vector<8x8x128xf32>
    tpu.vector_store %arg8[%c0_23, %c0_24, %c0_25], %27 {strides = array<i32>} : memref<8x8x128xf32, #tpu.memory_space<vmem>>, vector<8x8x128xf32>,
    %c0_26 = arith.constant 0 : index
    %c64 = arith.constant 64 : index
    %c0_27 = arith.constant 0 : index
    %29 = vector.load %arg2[%c0_26, %c64, %c0_27] : memref<8x256x40xbf16, #tpu.memory_space<vmem>>, vector<8x32x40xbf16>
    %30 = vector.shape_cast %29 : vector<8x32x40xbf16> to vector<256x40xbf16>
    %cst_28 = arith.constant dense<0.000000e+00> : vector<256x128xf32>
    %31 = tpu.matmul %30, %3, %cst_28 {dimension_numbers = #tpu.dot_dimension_numbers<[1], [0], [0], [1], [0, 0, 1, 1], [], []>} : vector<256x40xbf16>, vector<40x128xbf16>, vector<256x128xf32> -> vector<256x128xf32>
    %32 = vector.broadcast %4 : vector<1x128xf32> to vector<256x128xf32>
    %33 = arith.addf %31, %32 : vector<256x128xf32>
    %cst_29 = arith.constant 0.000000e+00 : f32
    %34 = vector.broadcast %cst_29 : f32 to vector<256x128xf32>
    %35 = arith.maximumf %33, %34 : vector<256x128xf32>
    %c0_30 = arith.constant 0 : index
    %c0_31 = arith.constant 0 : index
    %c0_32 = arith.constant 0 : index
    %36 = vector.load %arg8[%c0_30, %c0_31, %c0_32] : memref<8x8x128xf32, #tpu.memory_space<vmem>>, vector<8x8x128xf32>
    %37 = vector.shape_cast %35 : vector<256x128xf32> to vector<8x4x8x128xf32>
    %cst_33 = arith.constant dense<0.000000e+00> : vector<8x8x128xf32>
    %38 = vector.multi_reduction <add>, %37, %cst_33 [1] : vector<8x4x8x128xf32> to vector<8x8x128xf32>
    %39 = arith.addf %36, %38 : vector<8x8x128xf32>
    %c0_34 = arith.constant 0 : index
    %c0_35 = arith.constant 0 : index
    %c0_36 = arith.constant 0 : index
    %40 = vector.load %arg8[%c0_34, %c0_35, %c0_36] : memref<8x8x128xf32, #tpu.memory_space<vmem>>, vector<8x8x128xf32>
    tpu.vector_store %arg8[%c0_34, %c0_35, %c0_36], %39 {strides = array<i32>} : memref<8x8x128xf32, #tpu.memory_space<vmem>>, vector<8x8x128xf32>,
    %c0_37 = arith.constant 0 : index
    %c96 = arith.constant 96 : index
    %c0_38 = arith.constant 0 : index
    %41 = vector.load %arg2[%c0_37, %c96, %c0_38] : memref<8x256x40xbf16, #tpu.memory_space<vmem>>, vector<8x32x40xbf16>
    %42 = vector.shape_cast %41 : vector<8x32x40xbf16> to vector<256x40xbf16>
    %cst_39 = arith.constant dense<0.000000e+00> : vector<256x128xf32>
    %43 = tpu.matmul %42, %3, %cst_39 {dimension_numbers = #tpu.dot_dimension_numbers<[1], [0], [0], [1], [0, 0, 1, 1], [], []>} : vector<256x40xbf16>, vector<40x128xbf16>, vector<256x128xf32> -> vector<256x128xf32>
    %44 = vector.broadcast %4 : vector<1x128xf32> to vector<256x128xf32>
    %45 = arith.addf %43, %44 : vector<256x128xf32>
    %cst_40 = arith.constant 0.000000e+00 : f32
    %46 = vector.broadcast %cst_40 : f32 to vector<256x128xf32>
    %47 = arith.maximumf %45, %46 : vector<256x128xf32>
    %c0_41 = arith.constant 0 : index
    %c0_42 = arith.constant 0 : index
    %c0_43 = arith.constant 0 : index
    %48 = vector.load %arg8[%c0_41, %c0_42, %c0_43] : memref<8x8x128xf32, #tpu.memory_space<vmem>>, vector<8x8x128xf32>
    %49 = vector.shape_cast %47 : vector<256x128xf32> to vector<8x4x8x128xf32>
    %cst_44 = arith.constant dense<0.000000e+00> : vector<8x8x128xf32>
    %50 = vector.multi_reduction <add>, %49, %cst_44 [1] : vector<8x4x8x128xf32> to vector<8x8x128xf32>
    %51 = arith.addf %48, %50 : vector<8x8x128xf32>
    %c0_45 = arith.constant 0 : index
    %c0_46 = arith.constant 0 : index
    %c0_47 = arith.constant 0 : index
    %52 = vector.load %arg8[%c0_45, %c0_46, %c0_47] : memref<8x8x128xf32, #tpu.memory_space<vmem>>, vector<8x8x128xf32>
    tpu.vector_store %arg8[%c0_45, %c0_46, %c0_47], %51 {strides = array<i32>} : memref<8x8x128xf32, #tpu.memory_space<vmem>>, vector<8x8x128xf32>,
    %c0_48 = arith.constant 0 : index
    %c128 = arith.constant 128 : index
    %c0_49 = arith.constant 0 : index
    %53 = vector.load %arg2[%c0_48, %c128, %c0_49] : memref<8x256x40xbf16, #tpu.memory_space<vmem>>, vector<8x32x40xbf16>
    %54 = vector.shape_cast %53 : vector<8x32x40xbf16> to vector<256x40xbf16>
    %cst_50 = arith.constant dense<0.000000e+00> : vector<256x128xf32>
    %55 = tpu.matmul %54, %3, %cst_50 {dimension_numbers = #tpu.dot_dimension_numbers<[1], [0], [0], [1], [0, 0, 1, 1], [], []>} : vector<256x40xbf16>, vector<40x128xbf16>, vector<256x128xf32> -> vector<256x128xf32>
    %56 = vector.broadcast %4 : vector<1x128xf32> to vector<256x128xf32>
    %57 = arith.addf %55, %56 : vector<256x128xf32>
    %cst_51 = arith.constant 0.000000e+00 : f32
    %58 = vector.broadcast %cst_51 : f32 to vector<256x128xf32>
    %59 = arith.maximumf %57, %58 : vector<256x128xf32>
    %c0_52 = arith.constant 0 : index
    %c0_53 = arith.constant 0 : index
    %c0_54 = arith.constant 0 : index
    %60 = vector.load %arg8[%c0_52, %c0_53, %c0_54] : memref<8x8x128xf32, #tpu.memory_space<vmem>>, vector<8x8x128xf32>
    %61 = vector.shape_cast %59 : vector<256x128xf32> to vector<8x4x8x128xf32>
    %cst_55 = arith.constant dense<0.000000e+00> : vector<8x8x128xf32>
    %62 = vector.multi_reduction <add>, %61, %cst_55 [1] : vector<8x4x8x128xf32> to vector<8x8x128xf32>
    %63 = arith.addf %60, %62 : vector<8x8x128xf32>
    %c0_56 = arith.constant 0 : index
    %c0_57 = arith.constant 0 : index
    %c0_58 = arith.constant 0 : index
    %64 = vector.load %arg8[%c0_56, %c0_57, %c0_58] : memref<8x8x128xf32, #tpu.memory_space<vmem>>, vector<8x8x128xf32>
    tpu.vector_store %arg8[%c0_56, %c0_57, %c0_58], %63 {strides = array<i32>} : memref<8x8x128xf32, #tpu.memory_space<vmem>>, vector<8x8x128xf32>,
    %c0_59 = arith.constant 0 : index
    %c160 = arith.constant 160 : index
    %c0_60 = arith.constant 0 : index
    %65 = vector.load %arg2[%c0_59, %c160, %c0_60] : memref<8x256x40xbf16, #tpu.memory_space<vmem>>, vector<8x32x40xbf16>
    %66 = vector.shape_cast %65 : vector<8x32x40xbf16> to vector<256x40xbf16>
    %cst_61 = arith.constant dense<0.000000e+00> : vector<256x128xf32>
    %67 = tpu.matmul %66, %3, %cst_61 {dimension_numbers = #tpu.dot_dimension_numbers<[1], [0], [0], [1], [0, 0, 1, 1], [], []>} : vector<256x40xbf16>, vector<40x128xbf16>, vector<256x128xf32> -> vector<256x128xf32>
    %68 = vector.broadcast %4 : vector<1x128xf32> to vector<256x128xf32>
    %69 = arith.addf %67, %68 : vector<256x128xf32>
    %cst_62 = arith.constant 0.000000e+00 : f32
    %70 = vector.broadcast %cst_62 : f32 to vector<256x128xf32>
    %71 = arith.maximumf %69, %70 : vector<256x128xf32>
    %c0_63 = arith.constant 0 : index
    %c0_64 = arith.constant 0 : index
    %c0_65 = arith.constant 0 : index
    %72 = vector.load %arg8[%c0_63, %c0_64, %c0_65] : memref<8x8x128xf32, #tpu.memory_space<vmem>>, vector<8x8x128xf32>
    %73 = vector.shape_cast %71 : vector<256x128xf32> to vector<8x4x8x128xf32>
    %cst_66 = arith.constant dense<0.000000e+00> : vector<8x8x128xf32>
    %74 = vector.multi_reduction <add>, %73, %cst_66 [1] : vector<8x4x8x128xf32> to vector<8x8x128xf32>
    %75 = arith.addf %72, %74 : vector<8x8x128xf32>
    %c0_67 = arith.constant 0 : index
    %c0_68 = arith.constant 0 : index
    %c0_69 = arith.constant 0 : index
    %76 = vector.load %arg8[%c0_67, %c0_68, %c0_69] : memref<8x8x128xf32, #tpu.memory_space<vmem>>, vector<8x8x128xf32>
    tpu.vector_store %arg8[%c0_67, %c0_68, %c0_69], %75 {strides = array<i32>} : memref<8x8x128xf32, #tpu.memory_space<vmem>>, vector<8x8x128xf32>,
    %c0_70 = arith.constant 0 : index
    %c192 = arith.constant 192 : index
    %c0_71 = arith.constant 0 : index
    %77 = vector.load %arg2[%c0_70, %c192, %c0_71] : memref<8x256x40xbf16, #tpu.memory_space<vmem>>, vector<8x32x40xbf16>
    %78 = vector.shape_cast %77 : vector<8x32x40xbf16> to vector<256x40xbf16>
    %cst_72 = arith.constant dense<0.000000e+00> : vector<256x128xf32>
    %79 = tpu.matmul %78, %3, %cst_72 {dimension_numbers = #tpu.dot_dimension_numbers<[1], [0], [0], [1], [0, 0, 1, 1], [], []>} : vector<256x40xbf16>, vector<40x128xbf16>, vector<256x128xf32> -> vector<256x128xf32>
    %80 = vector.broadcast %4 : vector<1x128xf32> to vector<256x128xf32>
    %81 = arith.addf %79, %80 : vector<256x128xf32>
    %cst_73 = arith.constant 0.000000e+00 : f32
    %82 = vector.broadcast %cst_73 : f32 to vector<256x128xf32>
    %83 = arith.maximumf %81, %82 : vector<256x128xf32>
    %c0_74 = arith.constant 0 : index
    %c0_75 = arith.constant 0 : index
    %c0_76 = arith.constant 0 : index
    %84 = vector.load %arg8[%c0_74, %c0_75, %c0_76] : memref<8x8x128xf32, #tpu.memory_space<vmem>>, vector<8x8x128xf32>
    %85 = vector.shape_cast %83 : vector<256x128xf32> to vector<8x4x8x128xf32>
    %cst_77 = arith.constant dense<0.000000e+00> : vector<8x8x128xf32>
    %86 = vector.multi_reduction <add>, %85, %cst_77 [1] : vector<8x4x8x128xf32> to vector<8x8x128xf32>
    %87 = arith.addf %84, %86 : vector<8x8x128xf32>
    %c0_78 = arith.constant 0 : index
    %c0_79 = arith.constant 0 : index
    %c0_80 = arith.constant 0 : index
    %88 = vector.load %arg8[%c0_78, %c0_79, %c0_80] : memref<8x8x128xf32, #tpu.memory_space<vmem>>, vector<8x8x128xf32>
    tpu.vector_store %arg8[%c0_78, %c0_79, %c0_80], %87 {strides = array<i32>} : memref<8x8x128xf32, #tpu.memory_space<vmem>>, vector<8x8x128xf32>,
    %c0_81 = arith.constant 0 : index
    %c224 = arith.constant 224 : index
    %c0_82 = arith.constant 0 : index
    %89 = vector.load %arg2[%c0_81, %c224, %c0_82] : memref<8x256x40xbf16, #tpu.memory_space<vmem>>, vector<8x32x40xbf16>
    %90 = vector.shape_cast %89 : vector<8x32x40xbf16> to vector<256x40xbf16>
    %cst_83 = arith.constant dense<0.000000e+00> : vector<256x128xf32>
    %91 = tpu.matmul %90, %3, %cst_83 {dimension_numbers = #tpu.dot_dimension_numbers<[1], [0], [0], [1], [0, 0, 1, 1], [], []>} : vector<256x40xbf16>, vector<40x128xbf16>, vector<256x128xf32> -> vector<256x128xf32>
    %92 = vector.broadcast %4 : vector<1x128xf32> to vector<256x128xf32>
    %93 = arith.addf %91, %92 : vector<256x128xf32>
    %cst_84 = arith.constant 0.000000e+00 : f32
    %94 = vector.broadcast %cst_84 : f32 to vector<256x128xf32>
    %95 = arith.maximumf %93, %94 : vector<256x128xf32>
    %c0_85 = arith.constant 0 : index
    %c0_86 = arith.constant 0 : index
    %c0_87 = arith.constant 0 : index
    %96 = vector.load %arg8[%c0_85, %c0_86, %c0_87] : memref<8x8x128xf32, #tpu.memory_space<vmem>>, vector<8x8x128xf32>
    %97 = vector.shape_cast %95 : vector<256x128xf32> to vector<8x4x8x128xf32>
    %cst_88 = arith.constant dense<0.000000e+00> : vector<8x8x128xf32>
    %98 = vector.multi_reduction <add>, %97, %cst_88 [1] : vector<8x4x8x128xf32> to vector<8x8x128xf32>
    %99 = arith.addf %96, %98 : vector<8x8x128xf32>
    %c0_89 = arith.constant 0 : index
    %c0_90 = arith.constant 0 : index
    %c0_91 = arith.constant 0 : index
    %100 = vector.load %arg8[%c0_89, %c0_90, %c0_91] : memref<8x8x128xf32, #tpu.memory_space<vmem>>, vector<8x8x128xf32>
    tpu.vector_store %arg8[%c0_89, %c0_90, %c0_91], %99 {strides = array<i32>} : memref<8x8x128xf32, #tpu.memory_space<vmem>>, vector<8x8x128xf32>,
    %c0_i32_92 = arith.constant 0 : i32
    %101 = arith.cmpi eq, %arg1, %c0_i32_92 : i32
    %102 = arith.extui %101 : i1 to i32
    %c0_i32_93 = arith.constant 0 : i32
    %103 = arith.cmpi ne, %102, %c0_i32_93 : i32
    scf.if %103 {
      %c0_94 = arith.constant 0 : index
      %c0_95 = arith.constant 0 : index
      %c0_96 = arith.constant 0 : index
      %104 = vector.load %arg8[%c0_94, %c0_95, %c0_96] : memref<8x8x128xf32, #tpu.memory_space<vmem>>, vector<8x8x128xf32>
      %cst_97 = arith.constant dense<0.000000e+00> : vector<8x128xf32>
      %105 = vector.multi_reduction <add>, %104, %cst_97 [1] : vector<8x8x128xf32> to vector<8x128xf32>
      %cst_98 = arith.constant 3.906250e-03 : f32
      %106 = vector.broadcast %cst_98 : f32 to vector<8x128xf32>
      %107 = arith.mulf %105, %106 : vector<8x128xf32>
      %108 = arith.truncf %107 : vector<8x128xf32> to vector<8x128xbf16>
      %c0_99 = arith.constant 0 : index
      %c0_100 = arith.constant 0 : index
      %109 = vector.load %arg5[%c0_99, %c0_100] : memref<128x128xbf16, #tpu.memory_space<vmem>>, vector<128x128xbf16>
      %cst_101 = arith.constant dense<0.000000e+00> : vector<8x128xf32>
      %110 = tpu.matmul %108, %109, %cst_101 {dimension_numbers = #tpu.dot_dimension_numbers<[1], [0], [0], [1], [0, 0, 1, 1], [], []>} : vector<8x128xbf16>, vector<128x128xbf16>, vector<8x128xf32> -> vector<8x128xf32>
      %c0_102 = arith.constant 0 : index
      %c0_103 = arith.constant 0 : index
      %111 = vector.load %arg6[%c0_102, %c0_103] : memref<1x128xf32, #tpu.memory_space<vmem>>, vector<1x128xf32>
      %112 = vector.broadcast %111 : vector<1x128xf32> to vector<8x128xf32>
      %113 = arith.addf %110, %112 : vector<8x128xf32>
      %cst_104 = arith.constant dense<0xFF800000> : vector<8xf32>
      %114 = vector.multi_reduction <maximumf>, %113, %cst_104 [1] : vector<8x128xf32> to vector<8xf32>
      %115 = vector.shape_cast %114 : vector<8xf32> to vector<8x1xf32>
      %116 = vector.broadcast %115 : vector<8x1xf32> to vector<8x128xf32>
      %117 = arith.subf %113, %116 : vector<8x128xf32>
      %118 = math.exp %117 : vector<8x128xf32>
      %cst_105 = arith.constant dense<0.000000e+00> : vector<8xf32>
      %119 = vector.multi_reduction <add>, %118, %cst_105 [1] : vector<8x128xf32> to vector<8xf32>
      %120 = vector.shape_cast %119 : vector<8xf32> to vector<8x1xf32>
      %121 = vector.broadcast %120 : vector<8x1xf32> to vector<8x128xf32>
      %122 = arith.divf %118, %121 : vector<8x128xf32>
      %c0_106 = arith.constant 0 : index
      %c0_107 = arith.constant 0 : index
      %123 = vector.load %arg7[%c0_106, %c0_107] : memref<8x128xf32, #tpu.memory_space<vmem>>, vector<8x128xf32>
      tpu.vector_store %arg7[%c0_106, %c0_107], %122 {strides = array<i32>} : memref<8x128xf32, #tpu.memory_space<vmem>>, vector<8x128xf32>,
    } else {
    }
    return
  }
  func.func @transform_0(%arg0: i32, %arg1: i32) -> (i32, i32, i32) {
    %c0_i32 = arith.constant 0 : i32
    %c0_i32_0 = arith.constant 0 : i32
    return %arg0, %arg1, %c0_i32 : i32, i32, i32
  }
  func.func @transform_1(%arg0: i32, %arg1: i32) -> (i32, i32) {
    %c0_i32 = arith.constant 0 : i32
    %c0_i32_0 = arith.constant 0 : i32
    %c0_i32_1 = arith.constant 0 : i32
    return %c0_i32, %c0_i32_0 : i32, i32
  }
  func.func @transform_2(%arg0: i32, %arg1: i32) -> (i32, i32) {
    %c0_i32 = arith.constant 0 : i32
    %c0_i32_0 = arith.constant 0 : i32
    %c0_i32_1 = arith.constant 0 : i32
    return %c0_i32, %c0_i32_0 : i32, i32
  }
  func.func @transform_3(%arg0: i32, %arg1: i32) -> (i32, i32) {
    %c0_i32 = arith.constant 0 : i32
    %c0_i32_0 = arith.constant 0 : i32
    %c0_i32_1 = arith.constant 0 : i32
    return %c0_i32, %c0_i32_0 : i32, i32
  }
  func.func @transform_4(%arg0: i32, %arg1: i32) -> (i32, i32) {
    %c0_i32 = arith.constant 0 : i32
    %c0_i32_0 = arith.constant 0 : i32
    %c0_i32_1 = arith.constant 0 : i32
    return %c0_i32, %c0_i32_0 : i32, i32
  }
  func.func @transform_5(%arg0: i32, %arg1: i32) -> (i32, i32) {
    %c0_i32 = arith.constant 0 : i32
    %c0_i32_0 = arith.constant 0 : i32
    return %arg0, %c0_i32 : i32, i32
  }
}

</mosaic_0001>

<bundles_post_ra>
// kernel: ldl_model_forward.1
= control target key start
LH: loop header
LB: loop body
LE: loop exit
PB: predicated region body
PF: predicated region fallthrough
CT: control target
= control target key end

     0   :  { %vm218_vm0 = vcmask 1043456   ;;  %vm169_vm1 = vcmask 326656   ;;  %vm2805_vm2 = vcmask 1041409   ;;  %vm2807_vm3 = vcmask 1042434   ;;  %s4628_s1 = inlined_call_operand.vmem [shape: bf16[40,128], index: 1, kind: input, shape index: {}]   ;;  %s4629_s2 = inlined_call_operand.vmem [shape: f32[1,128], index: 2, kind: input, shape index: {}]   ;;  %s4630_s0 = inlined_call_operand.vmem [shape: bf16[8,256,40], index: 0, kind: input, shape index: {}]   ;;  %s4631_s3 = inlined_call_operand.vmem [shape: bf16[128,128], index: 3, kind: input, shape index: {}]   ;;  %s4632_s4 = inlined_call_operand.vmem [shape: f32[1,128], index: 4, kind: input, shape index: {}]   ;;  %s4633_s5 = inlined_call_operand.vmem [shape: f32[8,128], index: 5, kind: output, shape index: {}]  }
   0x1   :  { %v37_v0 = vld [vmem:[%s4628_s1 + $0x10] sm:$0xf]  ;;  %v3590_v4 = vld [vmem:[%s4628_s1 + $0x8] sm:$0xff]  ;;  %v3589_v5 = vld [vmem:[%s4628_s1] sm:$0xff]  ;;  %vm2809_vm4 = vcmask 1043459   ;;  %vm2811_vm5 = vcmask 1044484  }
   0x2   :  { %v163_v1 = vunpack.c.l.b16 %v37_v0  ;;  %v3591_v6 = vld [vmem:[%s4630_s0] sm:$0xff]  ;;  %v3607_v7 = vld [vmem:[%s4630_s0 + $0x10] sm:$0xff]  ;;  %v3592_v10 = vld [vmem:[%s4630_s0 + $0x8] sm:$0xff]  ;;  %vm2813_vm6 = vcmask 1045509   ;;  %vm2815_vm7 = vcmask 1046534   ;;  %vm2817_vm8 = vcmask 1047559  }
   0x3   :  { %v3623_v8 = vld [vmem:[%s4630_s0 + $0x20] sm:$0xff]  ;;  %v3639_v9 = vld [vmem:[%s4630_s0 + $0x30] sm:$0xff]  ;;  %v3608_v11 = vld [vmem:[%s4630_s0 + $0x18] sm:$0xff] }
   0x4   :  { %v166_v2 = vpack.c.b16 %v163_v1, %v163_v1  ;;  %v3624_v12 = vld [vmem:[%s4630_s0 + $0x28] sm:$0xff]  ;;  %v3640_v13 = vld [vmem:[%s4630_s0 + $0x38] sm:$0xff]  ;;  %v3593_v14 = vld [vmem:[%s4630_s0 + $0x80] sm:$0xff] }
   0x5   :  { %v3609_v15 = vld [vmem:[%s4630_s0 + $0x90] sm:$0xff]  ;;  %v3625_v16 = vld [vmem:[%s4630_s0 + $0xa0] sm:$0xff]  ;;  %v3594_v18 = vld [vmem:[%s4630_s0 + $0x88] sm:$0xff] }
   0x6   :  { %v220_v3 = vsel %vm218_vm0, %v166_v2, 0  ;;  %v3641_v17 = vld [vmem:[%s4630_s0 + $0xb0] sm:$0xff]  ;;  %v3610_v19 = vld [vmem:[%s4630_s0 + $0x98] sm:$0xff]  ;;  %v3626_v20 = vld [vmem:[%s4630_s0 + $0xa8] sm:$0xff] }
   0x7   :  { %227 = vmatpush.bf16.msra.mxu0 %v220_v3  ;;  %556 = vmatpush.bf16.msra.mxu1 %v220_v3  ;;  %v3642_v21 = vld [vmem:[%s4630_s0 + $0xb8] sm:$0xff]  ;;  %v3595_v22 = vld [vmem:[%s4630_s0 + $0x100] sm:$0xff]  ;;  %v3611_v23 = vld [vmem:[%s4630_s0 + $0x110] sm:$0xff] }
   0x8   :  { %885 = vmatpush.bf16.msra.mxu2 %v220_v3  ;;  %1214 = vmatpush.bf16.msra.mxu3 %v220_v3  ;;  %v3627_v24 = vld [vmem:[%s4630_s0 + $0x120] sm:$0xff]  ;;  %v3643_v25 = vld [vmem:[%s4630_s0 + $0x130] sm:$0xff]  ;;  %v3596_v26 = vld [vmem:[%s4630_s0 + $0x108] sm:$0xff] }
   0x9   :  { %v3612_v27 = vld [vmem:[%s4630_s0 + $0x118] sm:$0xff]  ;;  %v3628_v28 = vld [vmem:[%s4630_s0 + $0x128] sm:$0xff]  ;;  %v3597_v30 = vld [vmem:[%s4630_s0 + $0x180] sm:$0xff] }
   0xa   :  { %v3644_v29 = vld [vmem:[%s4630_s0 + $0x138] sm:$0xff]  ;;  %v3613_v31 = vld [vmem:[%s4630_s0 + $0x190] sm:$0xff]  ;;  %v3629_v32 = vld [vmem:[%s4630_s0 + $0x1a0] sm:$0xff] }
   0xb   :  { %228 = vmatpush.bf16.msra.mxu0 %v3590_v4  ;;  %557 = vmatpush.bf16.msra.mxu1 %v3590_v4  ;;  %v3645_v33 = vld [vmem:[%s4630_s0 + $0x1b0] sm:$0xff]  ;;  %v3598_v34 = vld [vmem:[%s4630_s0 + $0x188] sm:$0xff]  ;;  %v3614_v35 = vld [vmem:[%s4630_s0 + $0x198] sm:$0xff] }
   0xc   :  { %886 = vmatpush.bf16.msra.mxu2 %v3590_v4  ;;  %1215 = vmatpush.bf16.msra.mxu3 %v3590_v4  ;;  %v3630_v36 = vld [vmem:[%s4630_s0 + $0x1a8] sm:$0xff]  ;;  %v3646_v37 = vld [vmem:[%s4630_s0 + $0x1b8] sm:$0xff]  ;;  %v3599_v38 = vld [vmem:[%s4630_s0 + $0x200] sm:$0xff] }
   0xd   :  { %v3615_v39 = vld [vmem:[%s4630_s0 + $0x210] sm:$0xff]  ;;  %v3631_v42 = vld [vmem:[%s4630_s0 + $0x220] sm:$0xff]  ;;  %v3600_v63 = vld [vmem:[%s4630_s0 + $0x208] sm:$0xff] }
   0xe   :  { %v3647_v43 = vld [vmem:[%s4630_s0 + $0x230] sm:$0xff]  ;;  %v3917_v44 = vld [vmem:[%s4629_s2] ss:$0 sm:$0xff]  ;;  %v3616_v0 = vld [vmem:[%s4630_s0 + $0x218] sm:$0xff] }
   0xf   :  { %229 = vmatpush.bf16.msra.mxu0 %v3589_v5  ;;  %558 = vmatpush.bf16.msra.mxu1 %v3589_v5 }
  0x10   :  { %887 = vmatpush.bf16.msra.mxu2 %v3589_v5  ;;  %1216 = vmatpush.bf16.msra.mxu3 %v3589_v5 }
  0x12   :  { %2981 = vmatmul.msk.bf16.vlgmr.msra.gmra.mxu0 %vm169_vm1, %v3591_v6  ;;  %3061 = vmatmul.msk.bf16.vlgmr.msra.gmra.mxu1 %vm169_vm1, %v3607_v7  ;;  %v3648_v6 = vld [vmem:[%s4630_s0 + $0x238] sm:$0xff] }
  0x13   :  { %1543 = vmatpush.bf16.msrb.mxu0 %v220_v3  ;;  %3141 = vmatmul.msk.bf16.vlgmr.msra.gmra.mxu2 %vm169_vm1, %v3623_v8 }
  0x14   :  { %2201 = vmatpush.bf16.msrb.mxu2 %v220_v3  ;;  %3221 = vmatmul.msk.bf16.vlgmr.msra.gmra.mxu3 %vm169_vm1, %v3639_v9 }
  0x15   :  { %2530 = vmatpush.bf16.msrb.mxu3 %v220_v3  ;;  %1872 = vmatpush.bf16.msrb.mxu1 %v220_v3 }
  0x17   :  { %1544 = vmatpush.bf16.msrb.mxu0 %v3590_v4 }
  0x18   :  { %2202 = vmatpush.bf16.msrb.mxu2 %v3590_v4 }
  0x19   :  { %2531 = vmatpush.bf16.msrb.mxu3 %v3590_v4  ;;  %1873 = vmatpush.bf16.msrb.mxu1 %v3590_v4 }
  0x1b   :  { %1545 = vmatpush.bf16.msrb.mxu0 %v3589_v5 }
  0x1c   :  { %2203 = vmatpush.bf16.msrb.mxu2 %v3589_v5 }
  0x1d   :  { %2532 = vmatpush.bf16.msrb.mxu3 %v3589_v5  ;;  %1874 = vmatpush.bf16.msrb.mxu1 %v3589_v5  ;;  %v3632_v5 = vld [vmem:[%s4630_s0 + $0x228] sm:$0xff] }
  0x22   :  { %2982 = vmatmul.msk.bf16.gmra.mxu0 %vm169_vm1, %v3592_v10  ;;  %3062 = vmatmul.msk.bf16.gmra.mxu1 %vm169_vm1, %v3608_v11 }
  0x23   :  { %3142 = vmatmul.msk.bf16.gmra.mxu2 %vm169_vm1, %v3624_v12 }
  0x24   :  { %3222 = vmatmul.msk.bf16.gmra.mxu3 %vm169_vm1, %v3640_v13 }
  0x32   :  { %2983 = vmatmul.msk.bf16.gmra.mxu0 %vm169_vm1, %v3593_v14  ;;  %3063 = vmatmul.msk.bf16.gmra.mxu1 %vm169_vm1, %v3609_v15 }
  0x33   :  { %3143 = vmatmul.msk.bf16.gmra.mxu2 %vm169_vm1, %v3625_v16 }
  0x34   :  { %3223 = vmatmul.msk.bf16.gmra.mxu3 %vm169_vm1, %v3641_v17 }
  0x42   :  { %2984 = vmatmul.msk.bf16.gmra.mxu0 %vm169_vm1, %v3594_v18  ;;  %3064 = vmatmul.msk.bf16.gmra.mxu1 %vm169_vm1, %v3610_v19 }
  0x43   :  { %3144 = vmatmul.msk.bf16.gmra.mxu2 %vm169_vm1, %v3626_v20 }
  0x44   :  { %3224 = vmatmul.msk.bf16.gmra.mxu3 %vm169_vm1, %v3642_v21 }
  0x52   :  { %2985 = vmatmul.msk.bf16.gmra.mxu0 %vm169_vm1, %v3595_v22  ;;  %3065 = vmatmul.msk.bf16.gmra.mxu1 %vm169_vm1, %v3611_v23 }
  0x53   :  { %3145 = vmatmul.msk.bf16.gmra.mxu2 %vm169_vm1, %v3627_v24 }
  0x54   :  { %3225 = vmatmul.msk.bf16.gmra.mxu3 %vm169_vm1, %v3643_v25 }
  0x62   :  { %2986 = vmatmul.msk.bf16.gmra.mxu0 %vm169_vm1, %v3596_v26  ;;  %3066 = vmatmul.msk.bf16.gmra.mxu1 %vm169_vm1, %v3612_v27 }
  0x63   :  { %3146 = vmatmul.msk.bf16.gmra.mxu2 %vm169_vm1, %v3628_v28 }
  0x64   :  { %3226 = vmatmul.msk.bf16.gmra.mxu3 %vm169_vm1, %v3644_v29 }
  0x72   :  { %2987 = vmatmul.msk.bf16.gmra.mxu0 %vm169_vm1, %v3597_v30  ;;  %3067 = vmatmul.msk.bf16.gmra.mxu1 %vm169_vm1, %v3613_v31 }
  0x73   :  { %3147 = vmatmul.msk.bf16.gmra.mxu2 %vm169_vm1, %v3629_v32 }
  0x74   :  { %3227 = vmatmul.msk.bf16.gmra.mxu3 %vm169_vm1, %v3645_v33 }
  0x82   :  { %2988 = vmatmul.msk.bf16.gmra.mxu0 %vm169_vm1, %v3598_v34  ;;  %3068 = vmatmul.msk.bf16.gmra.mxu1 %vm169_vm1, %v3614_v35 }
  0x83   :  { %3148 = vmatmul.msk.bf16.gmra.mxu2 %vm169_vm1, %v3630_v36 }
  0x84   :  { %3228 = vmatmul.msk.bf16.gmra.mxu3 %vm169_vm1, %v3646_v37 }
  0x8f   :  { %v231_v40 = vpop.f32.mrf.mxu0  ;;  %v560_v41 = vpop.f32.mrf.mxu1 }
  0x90   :  { %v232_v45 = vadd.f32 %v3917_v44, %v231_v40  ;;  %v561_v46 = vadd.f32 %v3917_v44, %v560_v41 }
  0x92   :  { %2989 = vmatmul.msk.bf16.gmra.mxu0 %vm169_vm1, %v3599_v38  ;;  %3069 = vmatmul.msk.bf16.gmra.mxu1 %vm169_vm1, %v3615_v39  ;;  %v311_v53 = vmax.f32 %v232_v45, 0.0  ;;  %v640_v54 = vmax.f32 %v561_v46, 0.0  ;;  %v3601_v38 = vld [vmem:[%s4630_s0 + $0x280] sm:$0xff]  ;;  %v3617_v39 = vld [vmem:[%s4630_s0 + $0x290] sm:$0xff] }
  0x93   :  { %3149 = vmatmul.msk.bf16.gmra.mxu2 %vm169_vm1, %v3631_v42  ;;  %v3633_v45 = vld [vmem:[%s4630_s0 + $0x2a0] sm:$0xff]  ;;  %v3649_v46 = vld [vmem:[%s4630_s0 + $0x2b0] sm:$0xff] }
  0x94   :  { %3229 = vmatmul.msk.bf16.gmra.mxu3 %vm169_vm1, %v3647_v43 }
  0x96   :  { %v889_v47 = vpop.f32.mrf.mxu2 }
  0x97   :  { %v1218_v48 = vpop.f32.mrf.mxu3  ;;  %v233_v49 = vpop.f32.mrf.mxu0  ;;  %v890_v59 = vadd.f32 %v3917_v44, %v889_v47 }
  0x98   :  { %v562_v50 = vpop.f32.mrf.mxu1  ;;  %v234_v51 = vadd.f32 %v3917_v44, %v233_v49  ;;  %v1219_v60 = vadd.f32 %v3917_v44, %v1218_v48 }
  0x99   :  { %v563_v52 = vadd.f32 %v3917_v44, %v562_v50  ;;  %v969_v9 = vmax.f32 %v890_v59, 0.0 }
  0x9a   :  { %v312_v55 = vmax.f32 %v234_v51, 0.0  ;;  %v1298_v10 = vmax.f32 %v1219_v60, 0.0 }
  0x9b   :  { %v641_v56 = vmax.f32 %v563_v52, 0.0 }
  0x9c   :  { %v351_v57 = vadd.f32 %v312_v55, %v311_v53 }
  0x9d   :  { %v680_v58 = vadd.f32 %v641_v56, %v640_v54 }
  0x9e   :  { %v891_v61 = vpop.f32.mrf.mxu2 }
  0x9f   :  { %v1220_v62 = vpop.f32.mrf.mxu3  ;;  %v892_v1 = vadd.f32 %v3917_v44, %v891_v61  ;;  %v236_v3 = vpop.f32.mrf.mxu0 }
  0xa0   :  { %v1221_v2 = vadd.f32 %v3917_v44, %v1220_v62  ;;  %v565_v4 = vpop.f32.mrf.mxu1  ;;  %v237_v7 = vadd.f32 %v3917_v44, %v236_v3 }
  0xa1   :  { %v566_v8 = vadd.f32 %v3917_v44, %v565_v4  ;;  %v970_v11 = vmax.f32 %v892_v1, 0.0 }
  0xa2   :  { %v1299_v12 = vmax.f32 %v1221_v2, 0.0  ;;  %v313_v13 = vmax.f32 %v237_v7, 0.0  ;;  %2990 = vmatmul.msk.bf16.gmra.mxu0 %vm169_vm1, %v3600_v63  ;;  %3070 = vmatmul.msk.bf16.gmra.mxu1 %vm169_vm1, %v3616_v0  ;;  %v3602_v7 = vld [vmem:[%s4630_s0 + $0x288] sm:$0xff] }
  0xa3   :  { %v642_v14 = vmax.f32 %v566_v8, 0.0  ;;  %v1009_v15 = vadd.f32 %v970_v11, %v969_v9  ;;  %3150 = vmatmul.msk.bf16.gmra.mxu2 %vm169_vm1, %v3632_v5  ;;  %v3618_v8 = vld [vmem:[%s4630_s0 + $0x298] sm:$0xff] }
  0xa4   :  { %v1338_v16 = vadd.f32 %v1299_v12, %v1298_v10  ;;  %3230 = vmatmul.msk.bf16.gmra.mxu3 %vm169_vm1, %v3648_v6  ;;  %v352_v17 = vadd.f32 %v351_v57, %v313_v13  ;;  %v3634_v13 = vld [vmem:[%s4630_s0 + $0x2a8] sm:$0xff] }
  0xa5   :  { %v681_v18 = vadd.f32 %v680_v58, %v642_v14  ;;  %v3650_v14 = vld [vmem:[%s4630_s0 + $0x2b8] sm:$0xff] }
  0xa6   :  { %v894_v19 = vpop.f32.mrf.mxu2 }
  0xa7   :  { %v1223_v20 = vpop.f32.mrf.mxu3  ;;  %v895_v21 = vadd.f32 %v3917_v44, %v894_v19  ;;  %v238_v23 = vpop.f32.mrf.mxu0 }
  0xa8   :  { %v1224_v22 = vadd.f32 %v3917_v44, %v1223_v20  ;;  %v567_v24 = vpop.f32.mrf.mxu1  ;;  %v239_v25 = vadd.f32 %v3917_v44, %v238_v23 }
  0xa9   :  { %v568_v26 = vadd.f32 %v3917_v44, %v567_v24  ;;  %v971_v27 = vmax.f32 %v895_v21, 0.0 }
  0xaa   :  { %v1300_v28 = vmax.f32 %v1224_v22, 0.0  ;;  %v314_v29 = vmax.f32 %v239_v25, 0.0 }
  0xab   :  { %v643_v30 = vmax.f32 %v568_v26, 0.0  ;;  %v1010_v31 = vadd.f32 %v1009_v15, %v971_v27 }
  0xac   :  { %v1339_v32 = vadd.f32 %v1338_v16, %v1300_v28  ;;  %v353_v33 = vadd.f32 %v352_v17, %v314_v29 }
  0xad   :  { %v682_v34 = vadd.f32 %v681_v18, %v643_v30 }
  0xae   :  { %v896_v36 = vpop.f32.mrf.mxu2 }
  0xaf   :  { %v704_v35 = vadd.f32 %v682_v34, %v353_v33  ;;  %v1225_v37 = vpop.f32.mrf.mxu3  ;;  %v897_v40 = vadd.f32 %v3917_v44, %v896_v36  ;;  %v241_v42 = vpop.f32.mrf.mxu0 }
  0xb0   :  { %v1226_v41 = vadd.f32 %v3917_v44, %v1225_v37  ;;  %v570_v43 = vpop.f32.mrf.mxu1  ;;  %v242_v52 = vadd.f32 %v3917_v44, %v241_v42 }
  0xb1   :  { %v972_v47 = vmax.f32 %v897_v40, 0.0  ;;  %v571_v53 = vadd.f32 %v3917_v44, %v570_v43 }
  0xb2   :  { %v1301_v48 = vmax.f32 %v1226_v41, 0.0  ;;  %2991 = vmatmul.msk.bf16.gmra.mxu0 %vm169_vm1, %v3601_v38  ;;  %3071 = vmatmul.msk.bf16.gmra.mxu1 %vm169_vm1, %v3617_v39  ;;  %v315_v61 = vmax.f32 %v242_v52, 0.0 }
  0xb3   :  { %v1011_v49 = vadd.f32 %v1010_v31, %v972_v47  ;;  %3151 = vmatmul.msk.bf16.gmra.mxu2 %vm169_vm1, %v3633_v45  ;;  %v644_v62 = vmax.f32 %v571_v53, 0.0  ;;  %v3603_v47 = vld [vmem:[%s4630_s0 + $0x300] sm:$0xff] }
  0xb4   :  { %v1340_v50 = vadd.f32 %v1339_v32, %v1301_v48  ;;  %3231 = vmatmul.msk.bf16.gmra.mxu3 %vm169_vm1, %v3649_v46  ;;  %v3619_v48 = vld [vmem:[%s4630_s0 + $0x310] sm:$0xff]  ;;  %v3635_v53 = vld [vmem:[%s4630_s0 + $0x320] sm:$0xff] }
  0xb5   :  { %v1033_v51 = vadd.f32 %v1011_v49, %v704_v35 }
  0xb6   :  { %v899_v54 = vpop.f32.mrf.mxu2 }
  0xb7   :  { %v1228_v55 = vpop.f32.mrf.mxu3  ;;  %v3973_v56 = vadd.f32 %v1340_v50, %v1033_v51  ;;  %v243_v57 = vpop.f32.mrf.mxu0  ;;  %v900_v3 = vadd.f32 %v3917_v44, %v899_v54  ;;  %v3651_v54 = vld [vmem:[%s4630_s0 + $0x330] sm:$0xff] }
  0xb8   :  { %v572_v58 = vpop.f32.mrf.mxu1  ;;  %v244_v59 = vadd.f32 %v3917_v44, %v243_v57  ;;  %v1229_v4 = vadd.f32 %v3917_v44, %v1228_v55 }
  0xb9   :  { %v573_v60 = vadd.f32 %v3917_v44, %v572_v58  ;;  %v973_v17 = vmax.f32 %v900_v3, 0.0 }
  0xba   :  { %v316_v63 = vmax.f32 %v244_v59, 0.0  ;;  %v1302_v18 = vmax.f32 %v1229_v4, 0.0 }
  0xbb   :  { %v645_v0 = vmax.f32 %v573_v60, 0.0 }
  0xbc   :  { %v354_v1 = vadd.f32 %v316_v63, %v315_v61 }
  0xbd   :  { %v683_v2 = vadd.f32 %v645_v0, %v644_v62 }
  0xbe   :  { %v901_v5 = vpop.f32.mrf.mxu2 }
  0xbf   :  { %v1230_v6 = vpop.f32.mrf.mxu3  ;;  %v902_v9 = vadd.f32 %v3917_v44, %v901_v5  ;;  %v246_v11 = vpop.f32.mrf.mxu0 }
  0xc0   :  { %v1231_v10 = vadd.f32 %v3917_v44, %v1230_v6  ;;  %v575_v12 = vpop.f32.mrf.mxu1  ;;  %v247_v15 = vadd.f32 %v3917_v44, %v246_v11 }
  0xc1   :  { %v576_v16 = vadd.f32 %v3917_v44, %v575_v12  ;;  %v974_v19 = vmax.f32 %v902_v9, 0.0 }
  0xc2   :  { %v1303_v20 = vmax.f32 %v1231_v10, 0.0  ;;  %v317_v21 = vmax.f32 %v247_v15, 0.0  ;;  %2992 = vmatmul.msk.bf16.gmra.mxu0 %vm169_vm1, %v3602_v7  ;;  %3072 = vmatmul.msk.bf16.gmra.mxu1 %vm169_vm1, %v3618_v8 }
  0xc3   :  { %v646_v22 = vmax.f32 %v576_v16, 0.0  ;;  %v1012_v23 = vadd.f32 %v974_v19, %v973_v17  ;;  %3152 = vmatmul.msk.bf16.gmra.mxu2 %vm169_vm1, %v3634_v13  ;;  %v3604_v16 = vld [vmem:[%s4630_s0 + $0x308] sm:$0xff]  ;;  %v3620_v17 = vld [vmem:[%s4630_s0 + $0x318] sm:$0xff] }
  0xc4   :  { %v1341_v24 = vadd.f32 %v1303_v20, %v1302_v18  ;;  %3232 = vmatmul.msk.bf16.gmra.mxu3 %vm169_vm1, %v3650_v14  ;;  %v355_v25 = vadd.f32 %v354_v1, %v317_v21 }
  0xc5   :  { %v684_v26 = vadd.f32 %v683_v2, %v646_v22  ;;  %v3636_v22 = vld [vmem:[%s4630_s0 + $0x328] sm:$0xff] }
  0xc6   :  { %v904_v27 = vpop.f32.mrf.mxu2 }
  0xc7   :  { %v1233_v28 = vpop.f32.mrf.mxu3  ;;  %v905_v29 = vadd.f32 %v3917_v44, %v904_v27  ;;  %v248_v31 = vpop.f32.mrf.mxu0 }
  0xc8   :  { %v1234_v30 = vadd.f32 %v3917_v44, %v1233_v28  ;;  %v577_v32 = vpop.f32.mrf.mxu1  ;;  %v249_v33 = vadd.f32 %v3917_v44, %v248_v31 }
  0xc9   :  { %v578_v34 = vadd.f32 %v3917_v44, %v577_v32  ;;  %v975_v35 = vmax.f32 %v905_v29, 0.0 }
  0xca   :  { %v1304_v36 = vmax.f32 %v1234_v30, 0.0  ;;  %v318_v37 = vmax.f32 %v249_v33, 0.0 }
  0xcb   :  { %v647_v38 = vmax.f32 %v578_v34, 0.0  ;;  %v1013_v39 = vadd.f32 %v1012_v23, %v975_v35  ;;  %v3652_v23 = vld [vmem:[%s4630_s0 + $0x338] sm:$0xff] }
  0xcc   :  { %v1342_v40 = vadd.f32 %v1341_v24, %v1304_v36  ;;  %v356_v41 = vadd.f32 %v355_v25, %v318_v37 }
  0xcd   :  { %v685_v42 = vadd.f32 %v684_v26, %v647_v38 }
  0xce   :  { %v906_v45 = vpop.f32.mrf.mxu2 }
  0xcf   :  { %v705_v43 = vadd.f32 %v685_v42, %v356_v41  ;;  %v1235_v46 = vpop.f32.mrf.mxu3  ;;  %v907_v49 = vadd.f32 %v3917_v44, %v906_v45  ;;  %v251_v51 = vpop.f32.mrf.mxu0 }
  0xd0   :  { %v1236_v50 = vadd.f32 %v3917_v44, %v1235_v46  ;;  %v580_v52 = vpop.f32.mrf.mxu1  ;;  %v252_v61 = vadd.f32 %v3917_v44, %v251_v51 }
  0xd1   :  { %v976_v55 = vmax.f32 %v907_v49, 0.0  ;;  %v581_v62 = vadd.f32 %v3917_v44, %v580_v52 }
  0xd2   :  { %v1305_v57 = vmax.f32 %v1236_v50, 0.0  ;;  %2993 = vmatmul.msk.bf16.gmra.mxu0 %vm169_vm1, %v3603_v47  ;;  %3073 = vmatmul.msk.bf16.gmra.mxu1 %vm169_vm1, %v3619_v48  ;;  %v319_v6 = vmax.f32 %v252_v61, 0.0 }
  0xd3   :  { %v1014_v58 = vadd.f32 %v1013_v39, %v976_v55  ;;  %3153 = vmatmul.msk.bf16.gmra.mxu2 %vm169_vm1, %v3635_v53  ;;  %v648_v7 = vmax.f32 %v581_v62, 0.0 }
  0xd4   :  { %v1343_v59 = vadd.f32 %v1342_v40, %v1305_v57  ;;  %3233 = vmatmul.msk.bf16.gmra.mxu3 %vm169_vm1, %v3651_v54  ;;  %v3605_v57 = vld [vmem:[%s4630_s0 + $0x380] sm:$0xff] }
  0xd5   :  { %v1034_v60 = vadd.f32 %v1014_v58, %v705_v43  ;;  %v3621_v58 = vld [vmem:[%s4630_s0 + $0x390] sm:$0xff] }
  0xd6   :  { %v909_v63 = vpop.f32.mrf.mxu2 }
  0xd7   :  { %v1238_v0 = vpop.f32.mrf.mxu3  ;;  %v4023_v1 = vadd.f32 %v1343_v59, %v1034_v60  ;;  %v253_v2 = vpop.f32.mrf.mxu0  ;;  %v910_v12 = vadd.f32 %v3917_v44, %v909_v63  ;;  %v3637_v63 = vld [vmem:[%s4630_s0 + $0x3a0] sm:$0xff] }
  0xd8   :  { %v582_v3 = vpop.f32.mrf.mxu1  ;;  %v254_v4 = vadd.f32 %v3917_v44, %v253_v2  ;;  %v1239_v13 = vadd.f32 %v3917_v44, %v1238_v0  ;;  %v3653_v0 = vld [vmem:[%s4630_s0 + $0x3b0] sm:$0xff] }
  0xd9   :  { %v583_v5 = vadd.f32 %v3917_v44, %v582_v3  ;;  %v977_v26 = vmax.f32 %v910_v12, 0.0 }
  0xda   :  { %v320_v8 = vmax.f32 %v254_v4, 0.0  ;;  %v1306_v27 = vmax.f32 %v1239_v13, 0.0 }
  0xdb   :  { %v649_v9 = vmax.f32 %v583_v5, 0.0 }
  0xdc   :  { %v357_v10 = vadd.f32 %v320_v8, %v319_v6 }
  0xdd   :  { %v686_v11 = vadd.f32 %v649_v9, %v648_v7 }
  0xde   :  { %v911_v14 = vpop.f32.mrf.mxu2 }
  0xdf   :  { %v1240_v15 = vpop.f32.mrf.mxu3  ;;  %v912_v18 = vadd.f32 %v3917_v44, %v911_v14  ;;  %v256_v20 = vpop.f32.mrf.mxu0 }
  0xe0   :  { %v1241_v19 = vadd.f32 %v3917_v44, %v1240_v15  ;;  %v585_v21 = vpop.f32.mrf.mxu1  ;;  %v257_v24 = vadd.f32 %v3917_v44, %v256_v20 }
  0xe1   :  { %v586_v25 = vadd.f32 %v3917_v44, %v585_v21  ;;  %v978_v28 = vmax.f32 %v912_v18, 0.0 }
  0xe2   :  { %v1307_v29 = vmax.f32 %v1241_v19, 0.0  ;;  %v321_v30 = vmax.f32 %v257_v24, 0.0  ;;  %2994 = vmatmul.msk.bf16.gmra.mxu0 %vm169_vm1, %v3604_v16  ;;  %3074 = vmatmul.msk.bf16.gmra.mxu1 %vm169_vm1, %v3620_v17 }
  0xe3   :  { %v650_v31 = vmax.f32 %v586_v25, 0.0  ;;  %v1015_v32 = vadd.f32 %v978_v28, %v977_v26  ;;  %3154 = vmatmul.msk.bf16.gmra.mxu2 %vm169_vm1, %v3636_v22  ;;  %v3606_v26 = vld [vmem:[%s4630_s0 + $0x388] sm:$0xff] }
  0xe4   :  { %v1344_v33 = vadd.f32 %v1307_v29, %v1306_v27  ;;  %3234 = vmatmul.msk.bf16.gmra.mxu3 %vm169_vm1, %v3652_v23  ;;  %v358_v34 = vadd.f32 %v357_v10, %v321_v30  ;;  %v3622_v27 = vld [vmem:[%s4630_s0 + $0x398] sm:$0xff] }
  0xe5   :  { %v687_v35 = vadd.f32 %v686_v11, %v650_v31 }
  0xe6   :  { %v914_v36 = vpop.f32.mrf.mxu2 }
  0xe7   :  { %v1243_v37 = vpop.f32.mrf.mxu3  ;;  %v915_v38 = vadd.f32 %v3917_v44, %v914_v36  ;;  %v258_v40 = vpop.f32.mrf.mxu0 }
  0xe8   :  { %v1244_v39 = vadd.f32 %v3917_v44, %v1243_v37  ;;  %v587_v41 = vpop.f32.mrf.mxu1  ;;  %v259_v42 = vadd.f32 %v3917_v44, %v258_v40 }
  0xe9   :  { %v588_v43 = vadd.f32 %v3917_v44, %v587_v41  ;;  %v979_v45 = vmax.f32 %v915_v38, 0.0 }
  0xea   :  { %v1308_v46 = vmax.f32 %v1244_v39, 0.0  ;;  %v322_v47 = vmax.f32 %v259_v42, 0.0 }
  0xeb   :  { %v651_v48 = vmax.f32 %v588_v43, 0.0  ;;  %v1016_v49 = vadd.f32 %v1015_v32, %v979_v45  ;;  %v3638_v32 = vld [vmem:[%s4630_s0 + $0x3a8] sm:$0xff] }
  0xec   :  { %v1345_v50 = vadd.f32 %v1344_v33, %v1308_v46  ;;  %v359_v51 = vadd.f32 %v358_v34, %v322_v47  ;;  %v3654_v33 = vld [vmem:[%s4630_s0 + $0x3b8] sm:$0xff] }
  0xed   :  { %v688_v52 = vadd.f32 %v687_v35, %v651_v48 }
  0xee   :  { %v916_v54 = vpop.f32.mrf.mxu2 }
  0xef   :  { %v706_v53 = vadd.f32 %v688_v52, %v359_v51  ;;  %v1245_v55 = vpop.f32.mrf.mxu3  ;;  %v917_v59 = vadd.f32 %v3917_v44, %v916_v54  ;;  %v261_v61 = vpop.f32.mrf.mxu0 }
  0xf0   :  { %v1246_v60 = vadd.f32 %v3917_v44, %v1245_v55  ;;  %v590_v62 = vpop.f32.mrf.mxu1  ;;  %v262_v7 = vadd.f32 %v3917_v44, %v261_v61 }
  0xf1   :  { %v980_v2 = vmax.f32 %v917_v59, 0.0  ;;  %v591_v8 = vadd.f32 %v3917_v44, %v590_v62 }
  0xf2   :  { %v1309_v3 = vmax.f32 %v1246_v60, 0.0  ;;  %2995 = vmatmul.msk.bf16.gmra.mxu0 %vm169_vm1, %v3605_v57  ;;  %3075 = vmatmul.msk.bf16.gmra.mxu1 %vm169_vm1, %v3621_v58  ;;  %v323_v16 = vmax.f32 %v262_v7, 0.0 }
  0xf3   :  { %v1017_v4 = vadd.f32 %v1016_v49, %v980_v2  ;;  %3155 = vmatmul.msk.bf16.gmra.mxu2 %vm169_vm1, %v3637_v63  ;;  %v652_v17 = vmax.f32 %v591_v8, 0.0 }
  0xf4   :  { %v1346_v5 = vadd.f32 %v1345_v50, %v1309_v3  ;;  %3235 = vmatmul.msk.bf16.gmra.mxu3 %vm169_vm1, %v3653_v0 }
  0xf5   :  { %v1035_v6 = vadd.f32 %v1017_v4, %v706_v53  ;;  %v3655_v4 = vld [vmem:[%s4630_s0 + $0x40] sm:$0xff] }
  0xf6   :  { %v919_v9 = vpop.f32.mrf.mxu2 }
  0xf7   :  { %v1248_v10 = vpop.f32.mrf.mxu3  ;;  %v4073_v11 = vadd.f32 %v1346_v5, %v1035_v6  ;;  %v263_v12 = vpop.f32.mrf.mxu0  ;;  %v920_v22 = vadd.f32 %v3917_v44, %v919_v9  ;;  %v3671_v5 = vld [vmem:[%s4630_s0 + $0x50] sm:$0xff] }
  0xf8   :  { %v592_v13 = vpop.f32.mrf.mxu1  ;;  %v264_v14 = vadd.f32 %v3917_v44, %v263_v12  ;;  %v1249_v23 = vadd.f32 %v3917_v44, %v1248_v10  ;;  %v3687_v10 = vld [vmem:[%s4630_s0 + $0x60] sm:$0xff]  ;;  %v3703_v12 = vld [vmem:[%s4630_s0 + $0x70] sm:$0xff] }
  0xf9   :  { %v593_v15 = vadd.f32 %v3917_v44, %v592_v13  ;;  %v981_v36 = vmax.f32 %v920_v22, 0.0 }
  0xfa   :  { %v324_v18 = vmax.f32 %v264_v14, 0.0  ;;  %v1310_v37 = vmax.f32 %v1249_v23, 0.0 }
  0xfb   :  { %v653_v19 = vmax.f32 %v593_v15, 0.0 }
  0xfc   :  { %v360_v20 = vadd.f32 %v324_v18, %v323_v16 }
  0xfd   :  { %v689_v21 = vadd.f32 %v653_v19, %v652_v17 }
  0xfe   :  { %v921_v24 = vpop.f32.mrf.mxu2 }
  0xff   :  { %v1250_v25 = vpop.f32.mrf.mxu3  ;;  %v922_v28 = vadd.f32 %v3917_v44, %v921_v24  ;;  %v266_v30 = vpop.f32.mrf.mxu0 }
 0x100   :  { %v1251_v29 = vadd.f32 %v3917_v44, %v1250_v25  ;;  %v595_v31 = vpop.f32.mrf.mxu1  ;;  %v267_v34 = vadd.f32 %v3917_v44, %v266_v30 }
 0x101   :  { %v596_v35 = vadd.f32 %v3917_v44, %v595_v31  ;;  %v982_v38 = vmax.f32 %v922_v28, 0.0 }
 0x102   :  { %v1311_v39 = vmax.f32 %v1251_v29, 0.0  ;;  %v325_v40 = vmax.f32 %v267_v34, 0.0  ;;  %2996 = vmatmul.msk.bf16.gmra.mxu0 %vm169_vm1, %v3606_v26  ;;  %3076 = vmatmul.msk.bf16.gmra.mxu1 %vm169_vm1, %v3622_v27 }
 0x103   :  { %v654_v41 = vmax.f32 %v596_v35, 0.0  ;;  %v1018_v42 = vadd.f32 %v982_v38, %v981_v36  ;;  %3156 = vmatmul.msk.bf16.gmra.mxu2 %vm169_vm1, %v3638_v32  ;;  %v3672_v38 = vld [vmem:[%s4630_s0 + $0x58] sm:$0xff] }
 0x104   :  { %v1347_v43 = vadd.f32 %v1311_v39, %v1310_v37  ;;  %3236 = vmatmul.msk.bf16.gmra.mxu3 %vm169_vm1, %v3654_v33  ;;  %v361_v45 = vadd.f32 %v360_v20, %v325_v40  ;;  %v3656_v37 = vld [vmem:[%s4630_s0 + $0x48] sm:$0xff] }
 0x105   :  { %v690_v46 = vadd.f32 %v689_v21, %v654_v41 }
 0x106   :  { %v924_v47 = vpop.f32.mrf.mxu2 }
 0x107   :  { %v1253_v48 = vpop.f32.mrf.mxu3  ;;  %v925_v49 = vadd.f32 %v3917_v44, %v924_v47  ;;  %v268_v51 = vpop.f32.mrf.mxu0 }
 0x108   :  { %v1254_v50 = vadd.f32 %v3917_v44, %v1253_v48  ;;  %v597_v52 = vpop.f32.mrf.mxu1  ;;  %v269_v53 = vadd.f32 %v3917_v44, %v268_v51 }
 0x109   :  { %v598_v54 = vadd.f32 %v3917_v44, %v597_v52  ;;  %v983_v55 = vmax.f32 %v925_v49, 0.0 }
 0x10a   :  { %v1312_v57 = vmax.f32 %v1254_v50, 0.0  ;;  %v326_v58 = vmax.f32 %v269_v53, 0.0 }
 0x10b   :  { %v655_v59 = vmax.f32 %v598_v54, 0.0  ;;  %v1019_v60 = vadd.f32 %v1018_v42, %v983_v55 }
 0x10c   :  { %v1348_v61 = vadd.f32 %v1347_v43, %v1312_v57  ;;  %v362_v62 = vadd.f32 %v361_v45, %v326_v58  ;;  %v3688_v43 = vld [vmem:[%s4630_s0 + $0x68] sm:$0xff]  ;;  %v3704_v45 = vld [vmem:[%s4630_s0 + $0x78] sm:$0xff] }
 0x10d   :  { %v691_v63 = vadd.f32 %v690_v46, %v655_v59 }
 0x10e   :  { %v926_v2 = vpop.f32.mrf.mxu2 }
 0x10f   :  { %v707_v0 = vadd.f32 %v691_v63, %v362_v62  ;;  %v1255_v3 = vpop.f32.mrf.mxu3  ;;  %v927_v6 = vadd.f32 %v3917_v44, %v926_v2  ;;  %v271_v8 = vpop.f32.mrf.mxu0 }
 0x110   :  { %v1256_v7 = vadd.f32 %v3917_v44, %v1255_v3  ;;  %v600_v9 = vpop.f32.mrf.mxu1  ;;  %v272_v18 = vadd.f32 %v3917_v44, %v271_v8 }
 0x111   :  { %v984_v13 = vmax.f32 %v927_v6, 0.0  ;;  %v601_v19 = vadd.f32 %v3917_v44, %v600_v9 }
 0x112   :  { %v1313_v14 = vmax.f32 %v1256_v7, 0.0  ;;  %3301 = vmatmul.msk.bf16.vlgmr.msrb.gmra.mxu0 %vm169_vm1, %v3655_v4  ;;  %3381 = vmatmul.msk.bf16.vlgmr.msrb.gmra.mxu1 %vm169_vm1, %v3671_v5  ;;  %v327_v27 = vmax.f32 %v272_v18, 0.0 }
 0x113   :  { %v1020_v15 = vadd.f32 %v1019_v60, %v984_v13  ;;  %3461 = vmatmul.msk.bf16.vlgmr.msrb.gmra.mxu2 %vm169_vm1, %v3687_v10  ;;  %v656_v28 = vmax.f32 %v601_v19, 0.0 }
 0x114   :  { %v1349_v16 = vadd.f32 %v1348_v61, %v1313_v14  ;;  %3541 = vmatmul.msk.bf16.vlgmr.msrb.gmra.mxu3 %vm169_vm1, %v3703_v12 }
 0x115   :  { %v1036_v17 = vadd.f32 %v1020_v15, %v707_v0 }
 0x116   :  { %v929_v20 = vpop.f32.mrf.mxu2 }
 0x117   :  { %v1258_v21 = vpop.f32.mrf.mxu3  ;;  %v4123_v22 = vadd.f32 %v1349_v16, %v1036_v17  ;;  %v273_v23 = vpop.f32.mrf.mxu0  ;;  %v930_v33 = vadd.f32 %v3917_v44, %v929_v20  ;;  %v3657_v16 = vld [vmem:[%s4630_s0 + $0xc0] sm:$0xff]  ;;  %v3673_v17 = vld [vmem:[%s4630_s0 + $0xd0] sm:$0xff] }
 0x118   :  { %v602_v24 = vpop.f32.mrf.mxu1  ;;  %v274_v25 = vadd.f32 %v3917_v44, %v273_v23  ;;  %v1259_v34 = vadd.f32 %v3917_v44, %v1258_v21  ;;  %v3689_v23 = vld [vmem:[%s4630_s0 + $0xe0] sm:$0xff] }
 0x119   :  { %v603_v26 = vadd.f32 %v3917_v44, %v602_v24  ;;  %v985_v48 = vmax.f32 %v930_v33, 0.0  ;;  %v3705_v24 = vld [vmem:[%s4630_s0 + $0xf0] sm:$0xff] }
 0x11a   :  { %v328_v29 = vmax.f32 %v274_v25, 0.0  ;;  %v1314_v49 = vmax.f32 %v1259_v34, 0.0 }
 0x11b   :  { %v657_v30 = vmax.f32 %v603_v26, 0.0 }
 0x11c   :  { %v363_v31 = vadd.f32 %v328_v29, %v327_v27 }
 0x11d   :  { %v692_v32 = vadd.f32 %v657_v30, %v656_v28 }
 0x11e   :  { %v931_v35 = vpop.f32.mrf.mxu2 }
 0x11f   :  { %v1260_v36 = vpop.f32.mrf.mxu3  ;;  %v932_v39 = vadd.f32 %v3917_v44, %v931_v35  ;;  %v276_v41 = vpop.f32.mrf.mxu0 }
 0x120   :  { %v1261_v40 = vadd.f32 %v3917_v44, %v1260_v36  ;;  %v605_v42 = vpop.f32.mrf.mxu1  ;;  %v277_v46 = vadd.f32 %v3917_v44, %v276_v41 }
 0x121   :  { %v606_v47 = vadd.f32 %v3917_v44, %v605_v42  ;;  %v986_v50 = vmax.f32 %v932_v39, 0.0 }
 0x122   :  { %v1315_v51 = vmax.f32 %v1261_v40, 0.0  ;;  %v329_v52 = vmax.f32 %v277_v46, 0.0  ;;  %3302 = vmatmul.msk.bf16.gmra.mxu0 %vm169_vm1, %v3656_v37  ;;  %3382 = vmatmul.msk.bf16.gmra.mxu1 %vm169_vm1, %v3672_v38 }
 0x123   :  { %v658_v53 = vmax.f32 %v606_v47, 0.0  ;;  %v1021_v54 = vadd.f32 %v986_v50, %v985_v48  ;;  %3462 = vmatmul.msk.bf16.gmra.mxu2 %vm169_vm1, %v3688_v43  ;;  %v3658_v50 = vld [vmem:[%s4630_s0 + $0xc8] sm:$0xff] }
 0x124   :  { %v1350_v55 = vadd.f32 %v1315_v51, %v1314_v49  ;;  %3542 = vmatmul.msk.bf16.gmra.mxu3 %vm169_vm1, %v3704_v45  ;;  %v364_v57 = vadd.f32 %v363_v31, %v329_v52  ;;  %v3674_v51 = vld [vmem:[%s4630_s0 + $0xd8] sm:$0xff] }
 0x125   :  { %v693_v58 = vadd.f32 %v692_v32, %v658_v53 }
 0x126   :  { %v934_v59 = vpop.f32.mrf.mxu2 }
 0x127   :  { %v1263_v60 = vpop.f32.mrf.mxu3  ;;  %v935_v61 = vadd.f32 %v3917_v44, %v934_v59  ;;  %v278_v63 = vpop.f32.mrf.mxu0 }
 0x128   :  { %v1264_v62 = vadd.f32 %v3917_v44, %v1263_v60  ;;  %v607_v0 = vpop.f32.mrf.mxu1  ;;  %v279_v2 = vadd.f32 %v3917_v44, %v278_v63 }
 0x129   :  { %v608_v3 = vadd.f32 %v3917_v44, %v607_v0  ;;  %v987_v4 = vmax.f32 %v935_v61, 0.0 }
 0x12a   :  { %v1316_v5 = vmax.f32 %v1264_v62, 0.0  ;;  %v330_v6 = vmax.f32 %v279_v2, 0.0 }
 0x12b   :  { %v659_v7 = vmax.f32 %v608_v3, 0.0  ;;  %v1022_v8 = vadd.f32 %v1021_v54, %v987_v4 }
 0x12c   :  { %v1351_v9 = vadd.f32 %v1350_v55, %v1316_v5  ;;  %v365_v10 = vadd.f32 %v364_v57, %v330_v6  ;;  %v3690_v57 = vld [vmem:[%s4630_s0 + $0xe8] sm:$0xff] }
 0x12d   :  { %v694_v12 = vadd.f32 %v693_v58, %v659_v7  ;;  %v3706_v58 = vld [vmem:[%s4630_s0 + $0xf8] sm:$0xff] }
 0x12e   :  { %v936_v14 = vpop.f32.mrf.mxu2 }
 0x12f   :  { %v708_v13 = vadd.f32 %v694_v12, %v365_v10  ;;  %v1265_v15 = vpop.f32.mrf.mxu3  ;;  %v937_v18 = vadd.f32 %v3917_v44, %v936_v14  ;;  %v281_v20 = vpop.f32.mrf.mxu0 }
 0x130   :  { %v1266_v19 = vadd.f32 %v3917_v44, %v1265_v15  ;;  %v610_v21 = vpop.f32.mrf.mxu1  ;;  %v282_v30 = vadd.f32 %v3917_v44, %v281_v20 }
 0x131   :  { %v988_v25 = vmax.f32 %v937_v18, 0.0  ;;  %v611_v31 = vadd.f32 %v3917_v44, %v610_v21 }
 0x132   :  { %v1317_v26 = vmax.f32 %v1266_v19, 0.0  ;;  %3303 = vmatmul.msk.bf16.gmra.mxu0 %vm169_vm1, %v3657_v16  ;;  %3383 = vmatmul.msk.bf16.gmra.mxu1 %vm169_vm1, %v3673_v17  ;;  %v331_v39 = vmax.f32 %v282_v30, 0.0  ;;  %v3675_v30 = vld [vmem:[%s4630_s0 + $0x150] sm:$0xff] }
 0x133   :  { %v1023_v27 = vadd.f32 %v1022_v8, %v988_v25  ;;  %3463 = vmatmul.msk.bf16.gmra.mxu2 %vm169_vm1, %v3689_v23  ;;  %v660_v40 = vmax.f32 %v611_v31, 0.0 }
 0x134   :  { %v1352_v28 = vadd.f32 %v1351_v9, %v1317_v26  ;;  %3543 = vmatmul.msk.bf16.gmra.mxu3 %vm169_vm1, %v3705_v24 }
 0x135   :  { %v1037_v29 = vadd.f32 %v1023_v27, %v708_v13 }
 0x136   :  { %v939_v32 = vpop.f32.mrf.mxu2 }
 0x137   :  { %v1268_v33 = vpop.f32.mrf.mxu3  ;;  %v4173_v34 = vadd.f32 %v1352_v28, %v1037_v29  ;;  %v283_v35 = vpop.f32.mrf.mxu0  ;;  %v940_v46 = vadd.f32 %v3917_v44, %v939_v32  ;;  %v3659_v29 = vld [vmem:[%s4630_s0 + $0x140] sm:$0xff] }
 0x138   :  { %v612_v36 = vpop.f32.mrf.mxu1  ;;  %v284_v37 = vadd.f32 %v3917_v44, %v283_v35  ;;  %v1269_v47 = vadd.f32 %v3917_v44, %v1268_v33 }
 0x139   :  { %v613_v38 = vadd.f32 %v3917_v44, %v612_v36  ;;  %v989_v61 = vmax.f32 %v940_v46, 0.0  ;;  %v3691_v36 = vld [vmem:[%s4630_s0 + $0x160] sm:$0xff] }
 0x13a   :  { %v332_v41 = vmax.f32 %v284_v37, 0.0  ;;  %v1318_v62 = vmax.f32 %v1269_v47, 0.0  ;;  %v3707_v37 = vld [vmem:[%s4630_s0 + $0x170] sm:$0xff] }
 0x13b   :  { %v661_v42 = vmax.f32 %v613_v38, 0.0 }
 0x13c   :  { %v366_v43 = vadd.f32 %v332_v41, %v331_v39 }
 0x13d   :  { %v695_v45 = vadd.f32 %v661_v42, %v660_v40 }
 0x13e   :  { %v941_v48 = vpop.f32.mrf.mxu2 }
 0x13f   :  { %v1270_v49 = vpop.f32.mrf.mxu3  ;;  %v942_v52 = vadd.f32 %v3917_v44, %v941_v48  ;;  %v286_v54 = vpop.f32.mrf.mxu0 }
 0x140   :  { %v1271_v53 = vadd.f32 %v3917_v44, %v1270_v49  ;;  %v615_v55 = vpop.f32.mrf.mxu1  ;;  %v287_v59 = vadd.f32 %v3917_v44, %v286_v54 }
 0x141   :  { %v616_v60 = vadd.f32 %v3917_v44, %v615_v55  ;;  %v990_v63 = vmax.f32 %v942_v52, 0.0 }
 0x142   :  { %v1319_v0 = vmax.f32 %v1271_v53, 0.0  ;;  %v333_v2 = vmax.f32 %v287_v59, 0.0  ;;  %3304 = vmatmul.msk.bf16.gmra.mxu0 %vm169_vm1, %v3658_v50  ;;  %3384 = vmatmul.msk.bf16.gmra.mxu1 %vm169_vm1, %v3674_v51 }
 0x143   :  { %v662_v3 = vmax.f32 %v616_v60, 0.0  ;;  %v1024_v4 = vadd.f32 %v990_v63, %v989_v61  ;;  %3464 = vmatmul.msk.bf16.gmra.mxu2 %vm169_vm1, %v3690_v57 }
 0x144   :  { %v1353_v5 = vadd.f32 %v1319_v0, %v1318_v62  ;;  %3544 = vmatmul.msk.bf16.gmra.mxu3 %vm169_vm1, %v3706_v58  ;;  %v367_v6 = vadd.f32 %v366_v43, %v333_v2  ;;  %v3660_v0 = vld [vmem:[%s4630_s0 + $0x148] sm:$0xff]  ;;  %v3676_v2 = vld [vmem:[%s4630_s0 + $0x158] sm:$0xff] }
 0x145   :  { %v696_v7 = vadd.f32 %v695_v45, %v662_v3 }
 0x146   :  { %v944_v8 = vpop.f32.mrf.mxu2 }
 0x147   :  { %v1273_v9 = vpop.f32.mrf.mxu3  ;;  %v945_v10 = vadd.f32 %v3917_v44, %v944_v8  ;;  %v288_v13 = vpop.f32.mrf.mxu0  ;;  %v3708_v8 = vld [vmem:[%s4630_s0 + $0x178] sm:$0xff] }
 0x148   :  { %v1274_v12 = vadd.f32 %v3917_v44, %v1273_v9  ;;  %v617_v14 = vpop.f32.mrf.mxu1  ;;  %v289_v15 = vadd.f32 %v3917_v44, %v288_v13 }
 0x149   :  { %v618_v16 = vadd.f32 %v3917_v44, %v617_v14  ;;  %v991_v17 = vmax.f32 %v945_v10, 0.0 }
 0x14a   :  { %v1320_v18 = vmax.f32 %v1274_v12, 0.0  ;;  %v334_v19 = vmax.f32 %v289_v15, 0.0 }
 0x14b   :  { %v663_v20 = vmax.f32 %v618_v16, 0.0  ;;  %v1025_v21 = vadd.f32 %v1024_v4, %v991_v17 }
 0x14c   :  { %v1354_v23 = vadd.f32 %v1353_v5, %v1320_v18  ;;  %v368_v24 = vadd.f32 %v367_v6, %v334_v19 }
 0x14d   :  { %v697_v25 = vadd.f32 %v696_v7, %v663_v20  ;;  %v3692_v7 = vld [vmem:[%s4630_s0 + $0x168] sm:$0xff] }
 0x14e   :  { %v946_v27 = vpop.f32.mrf.mxu2 }
 0x14f   :  { %v709_v26 = vadd.f32 %v697_v25, %v368_v24  ;;  %v1275_v28 = vpop.f32.mrf.mxu3  ;;  %v947_v31 = vadd.f32 %v3917_v44, %v946_v27  ;;  %v291_v33 = vpop.f32.mrf.mxu0  ;;  %v4252_v24 = vld [vmem:[%s4629_s2] ss:$0 sm:$0xff] }
 0x150   :  { %v1276_v32 = vadd.f32 %v3917_v44, %v1275_v28  ;;  %v620_v35 = vpop.f32.mrf.mxu1  ;;  %v292_v43 = vadd.f32 %v3917_v44, %v291_v33 }
 0x151   :  { %v992_v38 = vmax.f32 %v947_v31, 0.0  ;;  %v621_v45 = vadd.f32 %v3917_v44, %v620_v35 }
 0x152   :  { %v1321_v39 = vmax.f32 %v1276_v32, 0.0  ;;  %3305 = vmatmul.msk.bf16.gmra.mxu0 %vm169_vm1, %v3659_v29  ;;  %3385 = vmatmul.msk.bf16.gmra.mxu1 %vm169_vm1, %v3675_v30  ;;  %v335_v53 = vmax.f32 %v292_v43, 0.0  ;;  %v3661_v43 = vld [vmem:[%s4630_s0 + $0x1c0] sm:$0xff] }
 0x153   :  { %v1026_v40 = vadd.f32 %v1025_v21, %v992_v38  ;;  %3465 = vmatmul.msk.bf16.gmra.mxu2 %vm169_vm1, %v3691_v36  ;;  %v664_v54 = vmax.f32 %v621_v45, 0.0  ;;  %v3677_v45 = vld [vmem:[%s4630_s0 + $0x1d0] sm:$0xff] }
 0x154   :  { %v1355_v41 = vadd.f32 %v1354_v23, %v1321_v39  ;;  %3545 = vmatmul.msk.bf16.gmra.mxu3 %vm169_vm1, %v3707_v37 }
 0x155   :  { %v1038_v42 = vadd.f32 %v1026_v40, %v709_v26 }
 0x156   :  { %v949_v46 = vpop.f32.mrf.mxu2 }
 0x157   :  { %v1278_v47 = vpop.f32.mrf.mxu3  ;;  %v4223_v48 = vadd.f32 %v1355_v41, %v1038_v42  ;;  %v293_v49 = vpop.f32.mrf.mxu0  ;;  %v950_v60 = vadd.f32 %v3917_v44, %v949_v46 }
 0x158   :  { %v622_v50 = vpop.f32.mrf.mxu1  ;;  %v294_v51 = vadd.f32 %v3917_v44, %v293_v49  ;;  %v1279_v61 = vadd.f32 %v3917_v44, %v1278_v47 }
 0x159   :  { %v623_v52 = vadd.f32 %v3917_v44, %v622_v50  ;;  %v993_v12 = vmax.f32 %v950_v60, 0.0 }
 0x15a   :  { %v336_v55 = vmax.f32 %v294_v51, 0.0  ;;  %v1322_v13 = vmax.f32 %v1279_v61, 0.0  ;;  %v3693_v51 = vld [vmem:[%s4630_s0 + $0x1e0] sm:$0xff] }
 0x15b   :  { %v665_v57 = vmax.f32 %v623_v52, 0.0  ;;  %v3709_v52 = vld [vmem:[%s4630_s0 + $0x1f0] sm:$0xff] }
 0x15c   :  { %v369_v58 = vadd.f32 %v336_v55, %v335_v53 }
 0x15d   :  { %v698_v59 = vadd.f32 %v665_v57, %v664_v54 }
 0x15e   :  { %v951_v62 = vpop.f32.mrf.mxu2 }
 0x15f   :  { %v1280_v63 = vpop.f32.mrf.mxu3  ;;  %v952_v3 = vadd.f32 %v3917_v44, %v951_v62  ;;  %v296_v5 = vpop.f32.mrf.mxu0 }
 0x160   :  { %v1281_v4 = vadd.f32 %v3917_v44, %v1280_v63  ;;  %v625_v6 = vpop.f32.mrf.mxu1  ;;  %v297_v9 = vadd.f32 %v3917_v44, %v296_v5 }
 0x161   :  { %v626_v10 = vadd.f32 %v3917_v44, %v625_v6  ;;  %v994_v14 = vmax.f32 %v952_v3, 0.0 }
 0x162   :  { %v1323_v15 = vmax.f32 %v1281_v4, 0.0  ;;  %v337_v16 = vmax.f32 %v297_v9, 0.0  ;;  %3306 = vmatmul.msk.bf16.gmra.mxu0 %vm169_vm1, %v3660_v0  ;;  %3386 = vmatmul.msk.bf16.gmra.mxu1 %vm169_vm1, %v3676_v2 }
 0x163   :  { %v666_v17 = vmax.f32 %v626_v10, 0.0  ;;  %v1027_v18 = vadd.f32 %v994_v14, %v993_v12  ;;  %3466 = vmatmul.msk.bf16.gmra.mxu2 %vm169_vm1, %v3692_v7 }
 0x164   :  { %v1356_v19 = vadd.f32 %v1323_v15, %v1322_v13  ;;  %3546 = vmatmul.msk.bf16.gmra.mxu3 %vm169_vm1, %v3708_v8  ;;  %v370_v20 = vadd.f32 %v369_v58, %v337_v16  ;;  %v3662_v16 = vld [vmem:[%s4630_s0 + $0x1c8] sm:$0xff] }
 0x165   :  { %v699_v21 = vadd.f32 %v698_v59, %v666_v17  ;;  %v3678_v17 = vld [vmem:[%s4630_s0 + $0x1d8] sm:$0xff] }
 0x166   :  { %v954_v23 = vpop.f32.mrf.mxu2 }
 0x167   :  { %v1283_v44 = vpop.f32.mrf.mxu3  ;;  %v955_v25 = vadd.f32 %v4252_v24, %v954_v23  ;;  %v298_v27 = vpop.f32.mrf.mxu0  ;;  %v3694_v23 = vld [vmem:[%s4630_s0 + $0x1e8] sm:$0xff] }
 0x168   :  { %v1284_v26 = vadd.f32 %v4252_v24, %v1283_v44  ;;  %v627_v28 = vpop.f32.mrf.mxu1  ;;  %v299_v29 = vadd.f32 %v4252_v24, %v298_v27  ;;  %v3710_v44 = vld [vmem:[%s4630_s0 + $0x1f8] sm:$0xff] }
 0x169   :  { %v628_v30 = vadd.f32 %v4252_v24, %v627_v28  ;;  %v995_v31 = vmax.f32 %v955_v25, 0.0 }
 0x16a   :  { %v1324_v32 = vmax.f32 %v1284_v26, 0.0  ;;  %v338_v33 = vmax.f32 %v299_v29, 0.0 }
 0x16b   :  { %v667_v35 = vmax.f32 %v628_v30, 0.0  ;;  %v1028_v36 = vadd.f32 %v1027_v18, %v995_v31 }
 0x16c   :  { %v1357_v37 = vadd.f32 %v1356_v19, %v1324_v32  ;;  %v371_v38 = vadd.f32 %v370_v20, %v338_v33 }
 0x16d   :  { %v700_v39 = vadd.f32 %v699_v21, %v667_v35 }
 0x16e   :  { %v956_v41 = vpop.f32.mrf.mxu2 }
 0x16f   :  { %v710_v40 = vadd.f32 %v700_v39, %v371_v38  ;;  %v1285_v42 = vpop.f32.mrf.mxu3  ;;  %v957_v46 = vadd.f32 %v4252_v24, %v956_v41  ;;  %v301_v49 = vpop.f32.mrf.mxu0 }
 0x170   :  { %v1286_v47 = vadd.f32 %v4252_v24, %v1285_v42  ;;  %v630_v50 = vpop.f32.mrf.mxu1  ;;  %v302_v59 = vadd.f32 %v4252_v24, %v301_v49 }
 0x171   :  { %v996_v53 = vmax.f32 %v957_v46, 0.0  ;;  %v631_v60 = vadd.f32 %v4252_v24, %v630_v50 }
 0x172   :  { %v1325_v54 = vmax.f32 %v1286_v47, 0.0  ;;  %3307 = vmatmul.msk.bf16.gmra.mxu0 %vm169_vm1, %v3661_v43  ;;  %3387 = vmatmul.msk.bf16.gmra.mxu1 %vm169_vm1, %v3677_v45  ;;  %v339_v5 = vmax.f32 %v302_v59, 0.0 }
 0x173   :  { %v1029_v55 = vadd.f32 %v1028_v36, %v996_v53  ;;  %3467 = vmatmul.msk.bf16.gmra.mxu2 %vm169_vm1, %v3693_v51  ;;  %v668_v6 = vmax.f32 %v631_v60, 0.0  ;;  %v3663_v60 = vld [vmem:[%s4630_s0 + $0x240] sm:$0xff] }
 0x174   :  { %v1358_v57 = vadd.f32 %v1357_v37, %v1325_v54  ;;  %3547 = vmatmul.msk.bf16.gmra.mxu3 %vm169_vm1, %v3709_v52 }
 0x175   :  { %v1039_v58 = vadd.f32 %v1029_v55, %v710_v40 }
 0x176   :  { %v959_v61 = vpop.f32.mrf.mxu2 }
 0x177   :  { %v1288_v62 = vpop.f32.mrf.mxu3  ;;  %v4278_v63 = vadd.f32 %v1358_v57, %v1039_v58  ;;  %v303_v0 = vpop.f32.mrf.mxu0  ;;  %v960_v12 = vadd.f32 %v4252_v24, %v959_v61  ;;  %v3679_v61 = vld [vmem:[%s4630_s0 + $0x250] sm:$0xff] }
 0x178   :  { %v632_v2 = vpop.f32.mrf.mxu1  ;;  %v304_v3 = vadd.f32 %v4252_v24, %v303_v0  ;;  %v1289_v13 = vadd.f32 %v4252_v24, %v1288_v62 }
 0x179   :  { %v633_v4 = vadd.f32 %v4252_v24, %v632_v2  ;;  %v997_v27 = vmax.f32 %v960_v12, 0.0 }
 0x17a   :  { %v340_v7 = vmax.f32 %v304_v3, 0.0  ;;  %v1326_v28 = vmax.f32 %v1289_v13, 0.0 }
 0x17b   :  { %v669_v8 = vmax.f32 %v633_v4, 0.0  ;;  %v3695_v4 = vld [vmem:[%s4630_s0 + $0x260] sm:$0xff] }
 0x17c   :  { %v372_v9 = vadd.f32 %v340_v7, %v339_v5  ;;  %v3711_v5 = vld [vmem:[%s4630_s0 + $0x270] sm:$0xff] }
 0x17d   :  { %v701_v10 = vadd.f32 %v669_v8, %v668_v6 }
 0x17e   :  { %v961_v14 = vpop.f32.mrf.mxu2 }
 0x17f   :  { %v1290_v15 = vpop.f32.mrf.mxu3  ;;  %v962_v18 = vadd.f32 %v4252_v24, %v961_v14  ;;  %v306_v20 = vpop.f32.mrf.mxu0 }
 0x180   :  { %v1291_v19 = vadd.f32 %v4252_v24, %v1290_v15  ;;  %v635_v21 = vpop.f32.mrf.mxu1  ;;  %v307_v25 = vadd.f32 %v4252_v24, %v306_v20 }
 0x181   :  { %v636_v26 = vadd.f32 %v4252_v24, %v635_v21  ;;  %v998_v29 = vmax.f32 %v962_v18, 0.0 }
 0x182   :  { %v1327_v30 = vmax.f32 %v1291_v19, 0.0  ;;  %v341_v31 = vmax.f32 %v307_v25, 0.0  ;;  %3308 = vmatmul.msk.bf16.gmra.mxu0 %vm169_vm1, %v3662_v16  ;;  %3388 = vmatmul.msk.bf16.gmra.mxu1 %vm169_vm1, %v3678_v17 }
 0x183   :  { %v670_v32 = vmax.f32 %v636_v26, 0.0  ;;  %v1030_v33 = vadd.f32 %v998_v29, %v997_v27  ;;  %3468 = vmatmul.msk.bf16.gmra.mxu2 %vm169_vm1, %v3694_v23 }
 0x184   :  { %v1359_v35 = vadd.f32 %v1327_v30, %v1326_v28  ;;  %3548 = vmatmul.msk.bf16.gmra.mxu3 %vm169_vm1, %v3710_v44  ;;  %v373_v36 = vadd.f32 %v372_v9, %v341_v31 }
 0x185   :  { %v702_v37 = vadd.f32 %v701_v10, %v670_v32  ;;  %v3664_v32 = vld [vmem:[%s4630_s0 + $0x248] sm:$0xff] }
 0x186   :  { %v964_v38 = vpop.f32.mrf.mxu2 }
 0x187   :  { %v1293_v39 = vpop.f32.mrf.mxu3  ;;  %v965_v40 = vadd.f32 %v4252_v24, %v964_v38  ;;  %v308_v42 = vpop.f32.mrf.mxu0 }
 0x188   :  { %v1294_v41 = vadd.f32 %v4252_v24, %v1293_v39  ;;  %v637_v43 = vpop.f32.mrf.mxu1  ;;  %v309_v45 = vadd.f32 %v4252_v24, %v308_v42  ;;  %v3696_v39 = vld [vmem:[%s4630_s0 + $0x268] sm:$0xff] }
 0x189   :  { %v638_v46 = vadd.f32 %v4252_v24, %v637_v43  ;;  %v999_v47 = vmax.f32 %v965_v40, 0.0  ;;  %v3712_v40 = vld [vmem:[%s4630_s0 + $0x278] sm:$0xff] }
 0x18a   :  { %v1328_v49 = vmax.f32 %v1294_v41, 0.0  ;;  %v342_v50 = vmax.f32 %v309_v45, 0.0 }
 0x18b   :  { %v671_v51 = vmax.f32 %v638_v46, 0.0  ;;  %v1031_v52 = vadd.f32 %v1030_v33, %v999_v47  ;;  %v3680_v33 = vld [vmem:[%s4630_s0 + $0x258] sm:$0xff] }
 0x18c   :  { %v1360_v53 = vadd.f32 %v1359_v35, %v1328_v49  ;;  %v374_v54 = vadd.f32 %v373_v36, %v342_v50 }
 0x18d   :  { %v703_v55 = vadd.f32 %v702_v37, %v671_v51 }
 0x18e   :  { %v966_v58 = vpop.f32.mrf.mxu2 }
 0x18f   :  { %v711_v57 = vadd.f32 %v703_v55, %v374_v54  ;;  %v1295_v59 = vpop.f32.mrf.mxu3  ;;  %v967_v62 = vadd.f32 %v4252_v24, %v966_v58  ;;  %v1547_v2 = vpop.f32.mrf.mxu0 }
 0x190   :  { %v1296_v0 = vadd.f32 %v4252_v24, %v1295_v59  ;;  %v1876_v3 = vpop.f32.mrf.mxu1  ;;  %v1548_v12 = vadd.f32 %v4252_v24, %v1547_v2 }
 0x191   :  { %v1000_v6 = vmax.f32 %v967_v62, 0.0  ;;  %v1877_v13 = vadd.f32 %v4252_v24, %v1876_v3 }
 0x192   :  { %v1329_v7 = vmax.f32 %v1296_v0, 0.0  ;;  %3309 = vmatmul.msk.bf16.gmra.mxu0 %vm169_vm1, %v3663_v60  ;;  %3389 = vmatmul.msk.bf16.gmra.mxu1 %vm169_vm1, %v3679_v61  ;;  %v1627_v21 = vmax.f32 %v1548_v12, 0.0 }
 0x193   :  { %v1032_v8 = vadd.f32 %v1031_v52, %v1000_v6  ;;  %3469 = vmatmul.msk.bf16.gmra.mxu2 %vm169_vm1, %v3695_v4  ;;  %v1956_v23 = vmax.f32 %v1877_v13, 0.0  ;;  %v3726_v4 = vld [vmem:[%s4631_s3 + $0x38] sm:$0xff] }
 0x194   :  { %v1361_v9 = vadd.f32 %v1360_v53, %v1329_v7  ;;  %3549 = vmatmul.msk.bf16.gmra.mxu3 %vm169_vm1, %v3711_v5  ;;  %2869 = vmatpush.bf16.msra.mxu0 %v3726_v4 }
 0x195   :  { %v1040_v10 = vadd.f32 %v1032_v8, %v711_v57 }
 0x196   :  { %v2205_v14 = vpop.f32.mrf.mxu2 }
 0x197   :  { %v2534_v15 = vpop.f32.mrf.mxu3  ;;  %v4328_v16 = vadd.f32 %v1361_v9, %v1040_v10  ;;  %v1549_v17 = vpop.f32.mrf.mxu0  ;;  %v2206_v28 = vadd.f32 %v4252_v24, %v2205_v14 }
 0x198   :  { %v1878_v18 = vpop.f32.mrf.mxu1  ;;  %v1550_v19 = vadd.f32 %v4252_v24, %v1549_v17  ;;  %v2535_v29 = vadd.f32 %v4252_v24, %v2534_v15  ;;  %v3665_v15 = vld [vmem:[%s4630_s0 + $0x2c0] sm:$0xff]  ;;  %v3681_v17 = vld [vmem:[%s4630_s0 + $0x2d0] sm:$0xff] }
 0x199   :  { %v1879_v20 = vadd.f32 %v4252_v24, %v1878_v18  ;;  %v2285_v43 = vmax.f32 %v2206_v28, 0.0 }
 0x19a   :  { %v1628_v44 = vmax.f32 %v1550_v19, 0.0  ;;  %v2614_v45 = vmax.f32 %v2535_v29, 0.0 }
 0x19b   :  { %v1957_v25 = vmax.f32 %v1879_v20, 0.0 }
 0x19c   :  { %v1667_v26 = vadd.f32 %v1628_v44, %v1627_v21 }
 0x19d   :  { %v1996_v27 = vadd.f32 %v1957_v25, %v1956_v23  ;;  %v3713_v23 = vld [vmem:[%s4630_s0 + $0x2f0] sm:$0xff] }
 0x19e   :  { %v2207_v30 = vpop.f32.mrf.mxu2 }
 0x19f   :  { %v2536_v31 = vpop.f32.mrf.mxu3  ;;  %v2208_v35 = vadd.f32 %v4252_v24, %v2207_v30  ;;  %v1552_v37 = vpop.f32.mrf.mxu0 }
 0x1a0   :  { %v2537_v36 = vadd.f32 %v4252_v24, %v2536_v31  ;;  %v1881_v38 = vpop.f32.mrf.mxu1  ;;  %v1553_v41 = vadd.f32 %v4252_v24, %v1552_v37 }
 0x1a1   :  { %v1882_v42 = vadd.f32 %v4252_v24, %v1881_v38  ;;  %v2286_v46 = vmax.f32 %v2208_v35, 0.0 }
 0x1a2   :  { %v2615_v47 = vmax.f32 %v2537_v36, 0.0  ;;  %v1629_v49 = vmax.f32 %v1553_v41, 0.0  ;;  %3310 = vmatmul.msk.bf16.gmra.mxu0 %vm169_vm1, %v3664_v32  ;;  %3390 = vmatmul.msk.bf16.gmra.mxu1 %vm169_vm1, %v3680_v33 }
 0x1a3   :  { %v1958_v50 = vmax.f32 %v1882_v42, 0.0  ;;  %v2325_v51 = vadd.f32 %v2286_v46, %v2285_v43  ;;  %3470 = vmatmul.msk.bf16.gmra.mxu2 %vm169_vm1, %v3696_v39 }
 0x1a4   :  { %v2654_v52 = vadd.f32 %v2615_v47, %v2614_v45  ;;  %3550 = vmatmul.msk.bf16.gmra.mxu3 %vm169_vm1, %v3712_v40  ;;  %v1668_v53 = vadd.f32 %v1667_v26, %v1629_v49 }
 0x1a5   :  { %v1997_v54 = vadd.f32 %v1996_v27, %v1958_v50 }
 0x1a6   :  { %v2210_v55 = vpop.f32.mrf.mxu2 }
 0x1a7   :  { %v2539_v57 = vpop.f32.mrf.mxu3  ;;  %v2211_v58 = vadd.f32 %v4252_v24, %v2210_v55  ;;  %v1554_v60 = vpop.f32.mrf.mxu0 }
 0x1a8   :  { %v2540_v59 = vadd.f32 %v4252_v24, %v2539_v57  ;;  %v1883_v61 = vpop.f32.mrf.mxu1  ;;  %v1555_v62 = vadd.f32 %v4252_v24, %v1554_v60  ;;  %v3714_v60 = vld [vmem:[%s4630_s0 + $0x2f8] sm:$0xff] }
 0x1a9   :  { %v1884_v0 = vadd.f32 %v4252_v24, %v1883_v61  ;;  %v2287_v2 = vmax.f32 %v2211_v58, 0.0 }
 0x1aa   :  { %v2616_v3 = vmax.f32 %v2540_v59, 0.0  ;;  %v1630_v5 = vmax.f32 %v1555_v62, 0.0  ;;  %v3698_v59 = vld [vmem:[%s4630_s0 + $0x2e8] sm:$0xff] }
 0x1ab   :  { %v1959_v6 = vmax.f32 %v1884_v0, 0.0  ;;  %v2326_v7 = vadd.f32 %v2325_v51, %v2287_v2 }
 0x1ac   :  { %v2655_v8 = vadd.f32 %v2654_v52, %v2616_v3  ;;  %v1669_v9 = vadd.f32 %v1668_v53, %v1630_v5  ;;  %v3666_v52 = vld [vmem:[%s4630_s0 + $0x2c8] sm:$0xff]  ;;  %v3682_v53 = vld [vmem:[%s4630_s0 + $0x2d8] sm:$0xff] }
 0x1ad   :  { %v1998_v10 = vadd.f32 %v1997_v54, %v1959_v6 }
 0x1ae   :  { %v1691_v12 = vadd.f32 %v1669_v9, %v3973_v56  ;;  %v2212_v13 = vpop.f32.mrf.mxu2  ;;  %v3697_v56 = vld [vmem:[%s4630_s0 + $0x2e0] sm:$0xff] }
 0x1af   :  { %v2541_v14 = vpop.f32.mrf.mxu3  ;;  %v2213_v18 = vadd.f32 %v4252_v24, %v2212_v13  ;;  %v1557_v20 = vpop.f32.mrf.mxu0 }
 0x1b0   :  { %v2542_v19 = vadd.f32 %v4252_v24, %v2541_v14  ;;  %v1886_v21 = vpop.f32.mrf.mxu1  ;;  %v2020_v44 = vadd.f32 %v1998_v10, %v1691_v12  ;;  %v1558_v30 = vadd.f32 %v4252_v24, %v1557_v20 }
 0x1b1   :  { %v2288_v25 = vmax.f32 %v2213_v18, 0.0  ;;  %v1887_v31 = vadd.f32 %v4252_v24, %v1886_v21 }
 0x1b2   :  { %v2617_v26 = vmax.f32 %v2542_v19, 0.0  ;;  %3311 = vmatmul.msk.bf16.gmra.mxu0 %vm169_vm1, %v3665_v15  ;;  %3391 = vmatmul.msk.bf16.gmra.mxu1 %vm169_vm1, %v3681_v17  ;;  %v1631_v40 = vmax.f32 %v1558_v30, 0.0 }
 0x1b3   :  { %v2327_v27 = vadd.f32 %v2326_v7, %v2288_v25  ;;  %3471 = vmatmul.msk.bf16.gmra.mxu2 %vm169_vm1, %v3697_v56  ;;  %v1960_v41 = vmax.f32 %v1887_v31, 0.0 }
 0x1b4   :  { %v2656_v28 = vadd.f32 %v2655_v8, %v2617_v26  ;;  %3551 = vmatmul.msk.bf16.gmra.mxu3 %vm169_vm1, %v3713_v23 }
 0x1b5   :  { %v2349_v29 = vadd.f32 %v2327_v27, %v2020_v44 }
 0x1b6   :  { %v2215_v32 = vpop.f32.mrf.mxu2 }
 0x1b7   :  { %v2544_v33 = vpop.f32.mrf.mxu3  ;;  %v2678_v35 = vadd.f32 %v2656_v28, %v2349_v29  ;;  %v1559_v36 = vpop.f32.mrf.mxu0  ;;  %v2216_v47 = vadd.f32 %v4252_v24, %v2215_v32  ;;  %v3725_v29 = vld [vmem:[%s4631_s3 + $0x30] sm:$0xff] }
 0x1b8   :  { %v1888_v37 = vpop.f32.mrf.mxu1  ;;  %v1560_v38 = vadd.f32 %v4252_v24, %v1559_v36  ;;  %v2545_v49 = vadd.f32 %v4252_v24, %v2544_v33  ;;  %2870 = vmatpush.bf16.msra.mxu0 %v3725_v29 }
 0x1b9   :  { %v1889_v39 = vadd.f32 %v4252_v24, %v1888_v37  ;;  %v2289_v0 = vmax.f32 %v2216_v47, 0.0  ;;  %v2705_v14 = vrot.slane %v2678_v35, 4  ;;  %v3667_v37 = vld [vmem:[%s4630_s0 + $0x340] sm:$0xff] }
 0x1ba   :  { %v1632_v42 = vmax.f32 %v1560_v38, 0.0  ;;  %v2618_v2 = vmax.f32 %v2545_v49, 0.0 }
 0x1bb   :  { %v1961_v43 = vmax.f32 %v1889_v39, 0.0  ;;  %v2706_v26 = vadd.f32 %v2705_v14, %v2678_v35  ;;  %v3683_v35 = vld [vmem:[%s4630_s0 + $0x350] sm:$0xff] }
 0x1bc   :  { %v1670_v45 = vadd.f32 %v1632_v42, %v1631_v40 }
 0x1bd   :  { %v1999_v46 = vadd.f32 %v1961_v43, %v1960_v41  ;;  %v2707_v38 = vrot.slane %v2706_v26, 2  ;;  %v3715_v43 = vld [vmem:[%s4630_s0 + $0x370] sm:$0xff] }
 0x1be   :  { %v2217_v50 = vpop.f32.mrf.mxu2 }
 0x1bf   :  { %v2546_v51 = vpop.f32.mrf.mxu3  ;;  %v2218_v54 = vadd.f32 %v4252_v24, %v2217_v50  ;;  %v1562_v57 = vpop.f32.mrf.mxu0  ;;  %v2708_v49 = vadd.f32 %v2707_v38, %v2706_v26 }
 0x1c0   :  { %v2547_v55 = vadd.f32 %v4252_v24, %v2546_v51  ;;  %v1891_v58 = vpop.f32.mrf.mxu1  ;;  %v1563_v61 = vadd.f32 %v4252_v24, %v1562_v57 }
 0x1c1   :  { %v1892_v62 = vadd.f32 %v4252_v24, %v1891_v58  ;;  %v2290_v3 = vmax.f32 %v2218_v54, 0.0  ;;  %v2709_v57 = vrot.slane %v2708_v49, 1 }
 0x1c2   :  { %v2619_v4 = vmax.f32 %v2547_v55, 0.0  ;;  %v1633_v5 = vmax.f32 %v1563_v61, 0.0  ;;  %3312 = vmatmul.msk.bf16.gmra.mxu0 %vm169_vm1, %v3666_v52  ;;  %3392 = vmatmul.msk.bf16.gmra.mxu1 %vm169_vm1, %v3682_v53 }
 0x1c3   :  { %v1962_v6 = vmax.f32 %v1892_v62, 0.0  ;;  %v2328_v7 = vadd.f32 %v2290_v3, %v2289_v0  ;;  %3472 = vmatmul.msk.bf16.gmra.mxu2 %vm169_vm1, %v3698_v59 }
 0x1c4   :  { %v2657_v8 = vadd.f32 %v2619_v4, %v2618_v2  ;;  %3552 = vmatmul.msk.bf16.gmra.mxu3 %vm169_vm1, %v3714_v60  ;;  %v1671_v9 = vadd.f32 %v1670_v45, %v1633_v5  ;;  %v2710_v4 = vadd.f32 %v2709_v57, %v2708_v49 }
 0x1c5   :  { %v2000_v10 = vadd.f32 %v1999_v46, %v1962_v6 }
 0x1c6   :  { %v2220_v12 = vpop.f32.mrf.mxu2 }
 0x1c7   :  { %v2549_v13 = vpop.f32.mrf.mxu3  ;;  %v2221_v15 = vadd.f32 %v4252_v24, %v2220_v12  ;;  %v1564_v18 = vpop.f32.mrf.mxu0 }
 0x1c8   :  { %v2550_v17 = vadd.f32 %v4252_v24, %v2549_v13  ;;  %v1893_v19 = vpop.f32.mrf.mxu1  ;;  %v1565_v20 = vadd.f32 %v4252_v24, %v1564_v18  ;;  %v2753_v18 = vmul.f32 0.00390625, %v2710_v4 }
 0x1c9   :  { %v1894_v21 = vadd.f32 %v4252_v24, %v1893_v19  ;;  %v2291_v56 = vmax.f32 %v2221_v15, 0.0  ;;  %v3668_v15 = vld [vmem:[%s4630_s0 + $0x348] sm:$0xff] }
 0x1ca   :  { %v2620_v23 = vmax.f32 %v2550_v17, 0.0  ;;  %v1634_v44 = vmax.f32 %v1565_v20, 0.0  ;;  %v3684_v17 = vld [vmem:[%s4630_s0 + $0x358] sm:$0xff] }
 0x1cb   :  { %v1963_v25 = vmax.f32 %v1894_v21, 0.0  ;;  %v2329_v27 = vadd.f32 %v2328_v7, %v2291_v56 }
 0x1cc   :  { %v2658_v28 = vadd.f32 %v2657_v8, %v2620_v23  ;;  %v1672_v30 = vadd.f32 %v1671_v9, %v1634_v44  ;;  %v3700_v44 = vld [vmem:[%s4630_s0 + $0x368] sm:$0xff] }
 0x1cd   :  { %v2001_v31 = vadd.f32 %v2000_v10, %v1963_v25  ;;  %v3716_v25 = vld [vmem:[%s4630_s0 + $0x378] sm:$0xff] }
 0x1ce   :  { %v1692_v32 = vadd.f32 %v1672_v30, %v4023_v1  ;;  %v2222_v33 = vpop.f32.mrf.mxu2  ;;  %v3699_v1 = vld [vmem:[%s4630_s0 + $0x360] sm:$0xff] }
 0x1cf   :  { %v2551_v36 = vpop.f32.mrf.mxu3  ;;  %v2223_v39 = vadd.f32 %v4252_v24, %v2222_v33  ;;  %v1567_v41 = vpop.f32.mrf.mxu0 }
 0x1d0   :  { %v2552_v40 = vadd.f32 %v4252_v24, %v2551_v36  ;;  %v1896_v42 = vpop.f32.mrf.mxu1  ;;  %v2021_v45 = vadd.f32 %v2001_v31, %v1692_v32  ;;  %v1568_v6 = vadd.f32 %v4252_v24, %v1567_v41 }
 0x1d1   :  { %v2292_v46 = vmax.f32 %v2223_v39, 0.0  ;;  %v1897_v53 = vadd.f32 %v4252_v24, %v1896_v42 }
 0x1d2   :  { %v2621_v47 = vmax.f32 %v2552_v40, 0.0  ;;  %3313 = vmatmul.msk.bf16.gmra.mxu0 %vm169_vm1, %v3667_v37  ;;  %3393 = vmatmul.msk.bf16.gmra.mxu1 %vm169_vm1, %v3683_v35  ;;  %v1635_v26 = vmax.f32 %v1568_v6, 0.0 }
 0x1d3   :  { %v2330_v50 = vadd.f32 %v2329_v27, %v2292_v46  ;;  %3473 = vmatmul.msk.bf16.gmra.mxu2 %vm169_vm1, %v3699_v1  ;;  %v1964_v0 = vmax.f32 %v1897_v53, 0.0  ;;  %v2761_v1 = vpack.c.bf16 %v2753_v18, %v2753_v18 }
 0x1d4   :  { %v2659_v51 = vadd.f32 %v2658_v28, %v2621_v47  ;;  %3553 = vmatmul.msk.bf16.gmra.mxu3 %vm169_vm1, %v3715_v43 }
 0x1d5   :  { %v2350_v52 = vadd.f32 %v2330_v50, %v2021_v45 }
 0x1d6   :  { %v2225_v54 = vpop.f32.mrf.mxu2 }
 0x1d7   :  { %v2554_v55 = vpop.f32.mrf.mxu3  ;;  %v2679_v58 = vadd.f32 %v2659_v51, %v2350_v52  ;;  %v1569_v59 = vpop.f32.mrf.mxu0  ;;  %v2226_v7 = vadd.f32 %v4252_v24, %v2225_v54 }
 0x1d8   :  { %v1898_v60 = vpop.f32.mrf.mxu1  ;;  %v1570_v2 = vadd.f32 %v4252_v24, %v1569_v59  ;;  %v2555_v10 = vadd.f32 %v4252_v24, %v2554_v55  ;;  %v2797_v55 = vunpack.c.l.b16 %v2761_v1 }
 0x1d9   :  { %v1899_v61 = vadd.f32 %v4252_v24, %v1898_v60  ;;  %v2711_v62 = vrot.slane %v2679_v58, 4  ;;  %v2293_v27 = vmax.f32 %v2226_v7, 0.0 }
 0x1da   :  { %v1636_v12 = vmax.f32 %v1570_v2, 0.0  ;;  %v2622_v31 = vmax.f32 %v2555_v10, 0.0  ;;  %v3685_v10 = vld [vmem:[%s4630_s0 + $0x3d0] sm:$0xff] }
 0x1db   :  { %v1965_v3 = vmax.f32 %v1899_v61, 0.0  ;;  %v2712_v5 = vadd.f32 %v2711_v62, %v2679_v58 }
 0x1dc   :  { %v1673_v36 = vadd.f32 %v1636_v12, %v1635_v26 }
 0x1dd   :  { %v2002_v8 = vadd.f32 %v1965_v3, %v1964_v0  ;;  %v2713_v9 = vrot.slane %v2712_v5, 2  ;;  %v3724_v3 = vld [vmem:[%s4631_s3 + $0x28] sm:$0xff] }
 0x1de   :  { %v2227_v13 = vpop.f32.mrf.mxu2  ;;  %2871 = vmatpush.bf16.msra.mxu0 %v3724_v3 }
 0x1df   :  { %v2556_v14 = vpop.f32.mrf.mxu3  ;;  %v2714_v19 = vadd.f32 %v2713_v9, %v2712_v5  ;;  %v2228_v20 = vadd.f32 %v4252_v24, %v2227_v13  ;;  %v1572_v56 = vpop.f32.mrf.mxu0  ;;  %v3669_v9 = vld [vmem:[%s4630_s0 + $0x3c0] sm:$0xff] }
 0x1e0   :  { %v2557_v21 = vadd.f32 %v4252_v24, %v2556_v14  ;;  %v1901_v23 = vpop.f32.mrf.mxu1  ;;  %v1573_v28 = vadd.f32 %v4252_v24, %v1572_v56 }
 0x1e1   :  { %v1902_v29 = vadd.f32 %v4252_v24, %v1901_v23  ;;  %v2715_v30 = vrot.slane %v2714_v19, 1  ;;  %v2294_v32 = vmax.f32 %v2228_v20, 0.0 }
 0x1e2   :  { %v2623_v33 = vmax.f32 %v2557_v21, 0.0  ;;  %v1637_v37 = vmax.f32 %v1573_v28, 0.0  ;;  %3314 = vmatmul.msk.bf16.gmra.mxu0 %vm169_vm1, %v3668_v15  ;;  %3394 = vmatmul.msk.bf16.gmra.mxu1 %vm169_vm1, %v3684_v17  ;;  %v3717_v17 = vld [vmem:[%s4630_s0 + $0x3f0] sm:$0xff] }
 0x1e3   :  { %v1966_v35 = vmax.f32 %v1902_v29, 0.0  ;;  %v2716_v38 = vadd.f32 %v2715_v30, %v2714_v19  ;;  %v2331_v39 = vadd.f32 %v2294_v32, %v2293_v27  ;;  %3474 = vmatmul.msk.bf16.gmra.mxu2 %vm169_vm1, %v3700_v44 }
 0x1e4   :  { %v2660_v40 = vadd.f32 %v2623_v33, %v2622_v31  ;;  %3554 = vmatmul.msk.bf16.gmra.mxu3 %vm169_vm1, %v3716_v25  ;;  %v1674_v41 = vadd.f32 %v1673_v36, %v1637_v37 }
 0x1e5   :  { %v2003_v42 = vadd.f32 %v2002_v8, %v1966_v35  ;;  %v2754_v43 = vmul.f32 0.00390625, %v2716_v38 }
 0x1e6   :  { %v2230_v45 = vpop.f32.mrf.mxu2 }
 0x1e7   :  { %v2559_v46 = vpop.f32.mrf.mxu3  ;;  %v2762_v47 = vpack.c.bf16 %v2754_v43, %v2754_v43  ;;  %v2231_v49 = vadd.f32 %v4252_v24, %v2230_v45  ;;  %v1574_v51 = vpop.f32.mrf.mxu0 }
 0x1e8   :  { %v2560_v50 = vadd.f32 %v4252_v24, %v2559_v46  ;;  %v1903_v52 = vpop.f32.mrf.mxu1  ;;  %v1575_v53 = vadd.f32 %v4252_v24, %v1574_v51 }
 0x1e9   :  { %v1904_v54 = vadd.f32 %v4252_v24, %v1903_v52  ;;  %v2798_v57 = vunpack.c.l.b16 %v2762_v47  ;;  %v2295_v58 = vmax.f32 %v2231_v49, 0.0  ;;  %v3670_v47 = vld [vmem:[%s4630_s0 + $0x3c8] sm:$0xff]  ;;  %v3686_v49 = vld [vmem:[%s4630_s0 + $0x3d8] sm:$0xff] }
 0x1ea   :  { %v2624_v59 = vmax.f32 %v2560_v50, 0.0  ;;  %v1638_v60 = vmax.f32 %v1575_v53, 0.0 }
 0x1eb   :  { %v1967_v61 = vmax.f32 %v1904_v54, 0.0  ;;  %v4462_v62 = vsel %vm2805_vm2, %v2798_v57, %v2797_v55  ;;  %v2332_v0 = vadd.f32 %v2331_v39, %v2295_v58  ;;  %v3702_v55 = vld [vmem:[%s4630_s0 + $0x3e8] sm:$0xff]  ;;  %v3718_v57 = vld [vmem:[%s4630_s0 + $0x3f8] sm:$0xff] }
 0x1ec   :  { %v2661_v2 = vadd.f32 %v2660_v40, %v2624_v59  ;;  %v1675_v4 = vadd.f32 %v1674_v41, %v1638_v60 }
 0x1ed   :  { %v2004_v5 = vadd.f32 %v2003_v42, %v1967_v61 }
 0x1ee   :  { %v1693_v6 = vadd.f32 %v1675_v4, %v4073_v11  ;;  %v2232_v7 = vpop.f32.mrf.mxu2  ;;  %v3701_v11 = vld [vmem:[%s4630_s0 + $0x3e0] sm:$0xff] }
 0x1ef   :  { %v2561_v8 = vpop.f32.mrf.mxu3  ;;  %v2233_v12 = vadd.f32 %v4252_v24, %v2232_v7  ;;  %v1577_v14 = vpop.f32.mrf.mxu0 }
 0x1f0   :  { %v2562_v13 = vadd.f32 %v4252_v24, %v2561_v8  ;;  %v1906_v15 = vpop.f32.mrf.mxu1  ;;  %v2022_v18 = vadd.f32 %v2004_v5, %v1693_v6  ;;  %v1578_v44 = vadd.f32 %v4252_v24, %v1577_v14 }
 0x1f1   :  { %v2296_v19 = vmax.f32 %v2233_v12, 0.0  ;;  %v1907_v25 = vadd.f32 %v4252_v24, %v1906_v15 }
 0x1f2   :  { %v2625_v20 = vmax.f32 %v2562_v13, 0.0  ;;  %3315 = vmatmul.msk.bf16.gmra.mxu0 %vm169_vm1, %v3669_v9  ;;  %3395 = vmatmul.msk.bf16.gmra.mxu1 %vm169_vm1, %v3685_v10  ;;  %v1639_v36 = vmax.f32 %v1578_v44, 0.0 }
 0x1f3   :  { %v2333_v21 = vadd.f32 %v2332_v0, %v2296_v19  ;;  %3475 = vmatmul.msk.bf16.gmra.mxu2 %vm169_vm1, %v3701_v11  ;;  %v1968_v37 = vmax.f32 %v1907_v25, 0.0 }
 0x1f4   :  { %v2662_v56 = vadd.f32 %v2661_v2, %v2625_v20  ;;  %3555 = vmatmul.msk.bf16.gmra.mxu3 %vm169_vm1, %v3717_v17 }
 0x1f5   :  { %v2351_v23 = vadd.f32 %v2333_v21, %v2022_v18 }
 0x1f6   :  { %v2235_v26 = vpop.f32.mrf.mxu2 }
 0x1f7   :  { %v2564_v27 = vpop.f32.mrf.mxu3  ;;  %v2680_v28 = vadd.f32 %v2662_v56, %v2351_v23  ;;  %v1579_v29 = vpop.f32.mrf.mxu0  ;;  %v2236_v40 = vadd.f32 %v4252_v24, %v2235_v26 }
 0x1f8   :  { %v1908_v30 = vpop.f32.mrf.mxu1  ;;  %v1580_v31 = vadd.f32 %v4252_v24, %v1579_v29  ;;  %v2565_v43 = vadd.f32 %v4252_v24, %v2564_v27 }
 0x1f9   :  { %v1909_v32 = vadd.f32 %v4252_v24, %v1908_v30  ;;  %v2717_v33 = vrot.slane %v2680_v28, 4  ;;  %v2297_v58 = vmax.f32 %v2236_v40, 0.0  ;;  %v3723_v30 = vld [vmem:[%s4631_s3 + $0x20] sm:$0xff] }
 0x1fa   :  { %v1640_v35 = vmax.f32 %v1580_v31, 0.0  ;;  %v2626_v0 = vmax.f32 %v2565_v43, 0.0  ;;  %2872 = vmatpush.bf16.msra.mxu0 %v3723_v30 }
 0x1fb   :  { %v1969_v38 = vmax.f32 %v1909_v32, 0.0  ;;  %v2718_v39 = vadd.f32 %v2717_v33, %v2680_v28 }
 0x1fc   :  { %v1676_v41 = vadd.f32 %v1640_v35, %v1639_v36 }
 0x1fd   :  { %v2005_v42 = vadd.f32 %v1969_v38, %v1968_v37  ;;  %v2719_v1 = vrot.slane %v2718_v39, 2 }
 0x1fe   :  { %v2237_v45 = vpop.f32.mrf.mxu2 }
 0x1ff   :  { %v2566_v46 = vpop.f32.mrf.mxu3  ;;  %v2720_v50 = vadd.f32 %v2719_v1, %v2718_v39  ;;  %v2238_v51 = vadd.f32 %v4252_v24, %v2237_v45  ;;  %v1582_v53 = vpop.f32.mrf.mxu0 }
 0x200   :  { %v2567_v52 = vadd.f32 %v4252_v24, %v2566_v46  ;;  %v1911_v54 = vpop.f32.mrf.mxu1  ;;  %v1583_v59 = vadd.f32 %v4252_v24, %v1582_v53 }
 0x201   :  { %v1912_v60 = vadd.f32 %v4252_v24, %v1911_v54  ;;  %v2721_v61 = vrot.slane %v2720_v50, 1  ;;  %v2298_v2 = vmax.f32 %v2238_v51, 0.0 }
 0x202   :  { %v2627_v3 = vmax.f32 %v2567_v52, 0.0  ;;  %v1641_v4 = vmax.f32 %v1583_v59, 0.0  ;;  %3316 = vmatmul.msk.bf16.gmra.mxu0 %vm169_vm1, %v3670_v47  ;;  %3396 = vmatmul.msk.bf16.gmra.mxu1 %vm169_vm1, %v3686_v49 }
 0x203   :  { %v1970_v5 = vmax.f32 %v1912_v60, 0.0  ;;  %v2722_v6 = vadd.f32 %v2721_v61, %v2720_v50  ;;  %v2334_v7 = vadd.f32 %v2298_v2, %v2297_v58  ;;  %3476 = vmatmul.msk.bf16.gmra.mxu2 %vm169_vm1, %v3702_v55 }
 0x204   :  { %v2663_v8 = vadd.f32 %v2627_v3, %v2626_v0  ;;  %3556 = vmatmul.msk.bf16.gmra.mxu3 %vm169_vm1, %v3718_v57  ;;  %v1677_v9 = vadd.f32 %v1676_v41, %v1641_v4 }
 0x205   :  { %v2006_v10 = vadd.f32 %v2005_v42, %v1970_v5  ;;  %v2755_v12 = vmul.f32 0.00390625, %v2722_v6 }
 0x206   :  { %v2240_v13 = vpop.f32.mrf.mxu2 }
 0x207   :  { %v2569_v14 = vpop.f32.mrf.mxu3  ;;  %v2763_v15 = vpack.c.bf16 %v2755_v12, %v2755_v12  ;;  %v2241_v11 = vadd.f32 %v4252_v24, %v2240_v13  ;;  %v1584_v18 = vpop.f32.mrf.mxu0 }
 0x208   :  { %v2570_v17 = vadd.f32 %v4252_v24, %v2569_v14  ;;  %v1913_v19 = vpop.f32.mrf.mxu1  ;;  %v1585_v20 = vadd.f32 %v4252_v24, %v1584_v18 }
 0x209   :  { %v1914_v21 = vadd.f32 %v4252_v24, %v1913_v19  ;;  %v2799_v56 = vunpack.c.l.b16 %v2763_v15  ;;  %v2299_v23 = vmax.f32 %v2241_v11, 0.0 }
 0x20a   :  { %v2628_v44 = vmax.f32 %v2570_v17, 0.0  ;;  %v1642_v25 = vmax.f32 %v1585_v20, 0.0 }
 0x20b   :  { %v1971_v26 = vmax.f32 %v1914_v21, 0.0  ;;  %v4517_v27 = vsel %vm2807_vm3, %v2799_v56, %v4462_v62  ;;  %v2335_v28 = vadd.f32 %v2334_v7, %v2299_v23 }
 0x20c   :  { %v2664_v29 = vadd.f32 %v2663_v8, %v2628_v44  ;;  %v1678_v31 = vadd.f32 %v1677_v9, %v1642_v25 }
 0x20d   :  { %v2007_v32 = vadd.f32 %v2006_v10, %v1971_v26 }
 0x20e   :  { %v1694_v33 = vadd.f32 %v1678_v31, %v4123_v22  ;;  %v2242_v36 = vpop.f32.mrf.mxu2 }
 0x20f   :  { %v2571_v37 = vpop.f32.mrf.mxu3  ;;  %v2243_v35 = vadd.f32 %v4252_v24, %v2242_v36  ;;  %v1587_v39 = vpop.f32.mrf.mxu0 }
 0x210   :  { %v2572_v38 = vadd.f32 %v4252_v24, %v2571_v37  ;;  %v1916_v62 = vpop.f32.mrf.mxu1  ;;  %v2023_v40 = vadd.f32 %v2007_v32, %v1694_v33  ;;  %v1588_v46 = vadd.f32 %v4252_v24, %v1587_v39 }
 0x211   :  { %v2300_v41 = vmax.f32 %v2243_v35, 0.0  ;;  %v1917_v47 = vadd.f32 %v4252_v24, %v1916_v62 }
 0x212   :  { %v2629_v42 = vmax.f32 %v2572_v38, 0.0  ;;  %v1643_v57 = vmax.f32 %v1588_v46, 0.0  ;;  %v4540_v38 = vld [vmem:[%s4629_s2] ss:$0 sm:$0xff] }
 0x213   :  { %v2336_v1 = vadd.f32 %v2335_v28, %v2300_v41  ;;  %v1972_v58 = vmax.f32 %v1917_v47, 0.0  ;;  %v3722_v47 = vld [vmem:[%s4631_s3 + $0x18] sm:$0xff] }
 0x214   :  { %v2665_v43 = vadd.f32 %v2664_v29, %v2629_v42  ;;  %2873 = vmatpush.bf16.msra.mxu0 %v3722_v47 }
 0x215   :  { %v2352_v45 = vadd.f32 %v2336_v1, %v2023_v40 }
 0x216   :  { %v2245_v49 = vpop.f32.mrf.mxu2 }
 0x217   :  { %v2574_v22 = vpop.f32.mrf.mxu3  ;;  %v2681_v50 = vadd.f32 %v2665_v43, %v2352_v45  ;;  %v1589_v51 = vpop.f32.mrf.mxu0  ;;  %v2246_v0 = vadd.f32 %v4252_v24, %v2245_v49 }
 0x218   :  { %v1918_v52 = vpop.f32.mrf.mxu1  ;;  %v1590_v53 = vadd.f32 %v4252_v24, %v1589_v51  ;;  %v2575_v5 = vadd.f32 %v4252_v24, %v2574_v22 }
 0x219   :  { %v1919_v54 = vadd.f32 %v4252_v24, %v1918_v52  ;;  %v2723_v55 = vrot.slane %v2681_v50, 4  ;;  %v2301_v14 = vmax.f32 %v2246_v0, 0.0 }
 0x21a   :  { %v1644_v59 = vmax.f32 %v1590_v53, 0.0  ;;  %v2630_v18 = vmax.f32 %v2575_v5, 0.0 }
 0x21b   :  { %v1973_v60 = vmax.f32 %v1919_v54, 0.0  ;;  %v2724_v61 = vadd.f32 %v2723_v55, %v2681_v50 }
 0x21c   :  { %v1679_v2 = vadd.f32 %v1644_v59, %v1643_v57 }
 0x21d   :  { %v2008_v3 = vadd.f32 %v1973_v60, %v1972_v58  ;;  %v2725_v4 = vrot.slane %v2724_v61, 2 }
 0x21e   :  { %v2247_v6 = vpop.f32.mrf.mxu2 }
 0x21f   :  { %v2576_v7 = vpop.f32.mrf.mxu3  ;;  %v2726_v8 = vadd.f32 %v2725_v4, %v2724_v61  ;;  %v2248_v9 = vadd.f32 %v4252_v24, %v2247_v6  ;;  %v1592_v12 = vpop.f32.mrf.mxu0 }
 0x220   :  { %v2577_v10 = vadd.f32 %v4252_v24, %v2576_v7  ;;  %v1921_v13 = vpop.f32.mrf.mxu1  ;;  %v1593_v15 = vadd.f32 %v4252_v24, %v1592_v12 }
 0x221   :  { %v1922_v11 = vadd.f32 %v4252_v24, %v1921_v13  ;;  %v2727_v17 = vrot.slane %v2726_v8, 1  ;;  %v2302_v19 = vmax.f32 %v2248_v9, 0.0 }
 0x222   :  { %v2631_v20 = vmax.f32 %v2577_v10, 0.0  ;;  %v1645_v21 = vmax.f32 %v1593_v15, 0.0 }
 0x223   :  { %v1974_v56 = vmax.f32 %v1922_v11, 0.0  ;;  %v2728_v23 = vadd.f32 %v2727_v17, %v2726_v8  ;;  %v2337_v44 = vadd.f32 %v2302_v19, %v2301_v14 }
 0x224   :  { %v2666_v25 = vadd.f32 %v2631_v20, %v2630_v18  ;;  %v1680_v26 = vadd.f32 %v1679_v2, %v1645_v21 }
 0x225   :  { %v2009_v28 = vadd.f32 %v2008_v3, %v1974_v56  ;;  %v2756_v29 = vmul.f32 0.00390625, %v2728_v23 }
 0x226   :  { %v2250_v30 = vpop.f32.mrf.mxu2 }
 0x227   :  { %v2579_v31 = vpop.f32.mrf.mxu3  ;;  %v2764_v32 = vpack.c.bf16 %v2756_v29, %v2756_v29  ;;  %v2251_v33 = vadd.f32 %v4252_v24, %v2250_v30  ;;  %v1594_v37 = vpop.f32.mrf.mxu0 }
 0x228   :  { %v2580_v36 = vadd.f32 %v4252_v24, %v2579_v31  ;;  %v1923_v35 = vpop.f32.mrf.mxu1  ;;  %v1595_v39 = vadd.f32 %v4540_v38, %v1594_v37 }
 0x229   :  { %v1924_v62 = vadd.f32 %v4540_v38, %v1923_v35  ;;  %v2800_v40 = vunpack.c.l.b16 %v2764_v32  ;;  %v2303_v41 = vmax.f32 %v2251_v33, 0.0 }
 0x22a   :  { %v2632_v42 = vmax.f32 %v2580_v36, 0.0  ;;  %v1646_v1 = vmax.f32 %v1595_v39, 0.0 }
 0x22b   :  { %v1975_v43 = vmax.f32 %v1924_v62, 0.0  ;;  %v4545_v45 = vsel %vm2809_vm4, %v2800_v40, %v4517_v27  ;;  %v2338_v24 = vadd.f32 %v2337_v44, %v2303_v41 }
 0x22c   :  { %v2667_v46 = vadd.f32 %v2666_v25, %v2632_v42  ;;  %v1681_v49 = vadd.f32 %v1680_v26, %v1646_v1 }
 0x22d   :  { %v2010_v22 = vadd.f32 %v2009_v28, %v1975_v43 }
 0x22e   :  { %v1695_v50 = vadd.f32 %v1681_v49, %v4173_v34  ;;  %v2252_v51 = vpop.f32.mrf.mxu2 }
 0x22f   :  { %v2581_v52 = vpop.f32.mrf.mxu3  ;;  %v2253_v53 = vadd.f32 %v4540_v38, %v2252_v51  ;;  %v1597_v55 = vpop.f32.mrf.mxu0 }
 0x230   :  { %v2582_v54 = vadd.f32 %v4540_v38, %v2581_v52  ;;  %v1926_v27 = vpop.f32.mrf.mxu1  ;;  %v2024_v57 = vadd.f32 %v2010_v22, %v1695_v50  ;;  %v1598_v2 = vadd.f32 %v4540_v38, %v1597_v55 }
 0x231   :  { %v2304_v58 = vmax.f32 %v2253_v53, 0.0  ;;  %v1927_v3 = vadd.f32 %v4540_v38, %v1926_v27 }
 0x232   :  { %v2633_v59 = vmax.f32 %v2582_v54, 0.0  ;;  %v1647_v12 = vmax.f32 %v1598_v2, 0.0 }
 0x233   :  { %v2339_v60 = vadd.f32 %v2338_v24, %v2304_v58  ;;  %v1976_v13 = vmax.f32 %v1927_v3, 0.0  ;;  %v3721_v58 = vld [vmem:[%s4631_s3 + $0x10] sm:$0xff] }
 0x234   :  { %v2668_v61 = vadd.f32 %v2667_v46, %v2633_v59  ;;  %2874 = vmatpush.bf16.msra.mxu0 %v3721_v58 }
 0x235   :  { %v2353_v0 = vadd.f32 %v2339_v60, %v2024_v57 }
 0x236   :  { %v2255_v4 = vpop.f32.mrf.mxu2 }
 0x237   :  { %v2584_v34 = vpop.f32.mrf.mxu3  ;;  %v2682_v5 = vadd.f32 %v2668_v61, %v2353_v0  ;;  %v1599_v6 = vpop.f32.mrf.mxu0  ;;  %v2256_v17 = vadd.f32 %v4540_v38, %v2255_v4 }
 0x238   :  { %v1928_v7 = vpop.f32.mrf.mxu1  ;;  %v1600_v8 = vadd.f32 %v4540_v38, %v1599_v6  ;;  %v2585_v21 = vadd.f32 %v4540_v38, %v2584_v34 }
 0x239   :  { %v1929_v9 = vadd.f32 %v4540_v38, %v1928_v7  ;;  %v2729_v10 = vrot.slane %v2682_v5, 4  ;;  %v2305_v30 = vmax.f32 %v2256_v17, 0.0 }
 0x23a   :  { %v1648_v14 = vmax.f32 %v1600_v8, 0.0  ;;  %v2634_v36 = vmax.f32 %v2585_v21, 0.0 }
 0x23b   :  { %v1977_v15 = vmax.f32 %v1929_v9, 0.0  ;;  %v2730_v11 = vadd.f32 %v2729_v10, %v2682_v5 }
 0x23c   :  { %v1682_v18 = vadd.f32 %v1648_v14, %v1647_v12 }
 0x23d   :  { %v2011_v19 = vadd.f32 %v1977_v15, %v1976_v13  ;;  %v2731_v20 = vrot.slane %v2730_v11, 2 }
 0x23e   :  { %v2257_v56 = vpop.f32.mrf.mxu2 }
 0x23f   :  { %v2586_v23 = vpop.f32.mrf.mxu3  ;;  %v2732_v44 = vadd.f32 %v2731_v20, %v2730_v11  ;;  %v2258_v25 = vadd.f32 %v4540_v38, %v2257_v56  ;;  %v1602_v28 = vpop.f32.mrf.mxu0 }
 0x240   :  { %v2587_v26 = vadd.f32 %v4540_v38, %v2586_v23  ;;  %v1931_v29 = vpop.f32.mrf.mxu1  ;;  %v1603_v31 = vadd.f32 %v4540_v38, %v1602_v28 }
 0x241   :  { %v1932_v32 = vadd.f32 %v4540_v38, %v1931_v29  ;;  %v2733_v33 = vrot.slane %v2732_v44, 1  ;;  %v2306_v37 = vmax.f32 %v2258_v25, 0.0 }
 0x242   :  { %v2635_v35 = vmax.f32 %v2587_v26, 0.0  ;;  %v1649_v39 = vmax.f32 %v1603_v31, 0.0 }
 0x243   :  { %v1978_v62 = vmax.f32 %v1932_v32, 0.0  ;;  %v2734_v40 = vadd.f32 %v2733_v33, %v2732_v44  ;;  %v2340_v41 = vadd.f32 %v2306_v37, %v2305_v30 }
 0x244   :  { %v2669_v42 = vadd.f32 %v2635_v35, %v2634_v36  ;;  %v1683_v1 = vadd.f32 %v1682_v18, %v1649_v39 }
 0x245   :  { %v2012_v43 = vadd.f32 %v2011_v19, %v1978_v62  ;;  %v2757_v24 = vmul.f32 0.00390625, %v2734_v40 }
 0x246   :  { %v2260_v46 = vpop.f32.mrf.mxu2 }
 0x247   :  { %v2589_v47 = vpop.f32.mrf.mxu3  ;;  %v2765_v49 = vpack.c.bf16 %v2757_v24, %v2757_v24  ;;  %v2261_v22 = vadd.f32 %v4540_v38, %v2260_v46  ;;  %v1604_v51 = vpop.f32.mrf.mxu0 }
 0x248   :  { %v2590_v50 = vadd.f32 %v4540_v38, %v2589_v47  ;;  %v1933_v52 = vpop.f32.mrf.mxu1  ;;  %v1605_v53 = vadd.f32 %v4540_v38, %v1604_v51 }
 0x249   :  { %v1934_v54 = vadd.f32 %v4540_v38, %v1933_v52  ;;  %v2801_v55 = vunpack.c.l.b16 %v2765_v49  ;;  %v2307_v27 = vmax.f32 %v2261_v22, 0.0 }
 0x24a   :  { %v2636_v57 = vmax.f32 %v2590_v50, 0.0  ;;  %v1650_v59 = vmax.f32 %v1605_v53, 0.0 }
 0x24b   :  { %v1979_v60 = vmax.f32 %v1934_v54, 0.0  ;;  %v4571_v61 = vsel %vm2811_vm5, %v2801_v55, %v4545_v45  ;;  %v2341_v0 = vadd.f32 %v2340_v41, %v2307_v27 }
 0x24c   :  { %v2670_v2 = vadd.f32 %v2669_v42, %v2636_v57  ;;  %v1684_v3 = vadd.f32 %v1683_v1, %v1650_v59  ;;  %v3720_v59 = vld [vmem:[%s4631_s3 + $0x8] sm:$0xff] }
 0x24d   :  { %v2013_v34 = vadd.f32 %v2012_v43, %v1979_v60  ;;  %2875 = vmatpush.bf16.msra.mxu0 %v3720_v59 }
 0x24e   :  { %v1696_v4 = vadd.f32 %v1684_v3, %v4223_v48  ;;  %v2262_v5 = vpop.f32.mrf.mxu2 }
 0x24f   :  { %v2591_v6 = vpop.f32.mrf.mxu3  ;;  %v2263_v7 = vadd.f32 %v4540_v38, %v2262_v5  ;;  %v1607_v9 = vpop.f32.mrf.mxu0 }
 0x250   :  { %v2592_v8 = vadd.f32 %v4540_v38, %v2591_v6  ;;  %v1936_v10 = vpop.f32.mrf.mxu1  ;;  %v2025_v12 = vadd.f32 %v2013_v34, %v1696_v4  ;;  %v1608_v32 = vadd.f32 %v4540_v38, %v1607_v9 }
 0x251   :  { %v2308_v13 = vmax.f32 %v2263_v7, 0.0  ;;  %v1937_v37 = vadd.f32 %v4540_v38, %v1936_v10 }
 0x252   :  { %v2637_v14 = vmax.f32 %v2592_v8, 0.0  ;;  %v1651_v40 = vmax.f32 %v1608_v32, 0.0 }
 0x253   :  { %v2342_v45 = vadd.f32 %v2341_v0, %v2308_v13  ;;  %v1980_v47 = vmax.f32 %v1937_v37, 0.0 }
 0x254   :  { %v2671_v11 = vadd.f32 %v2670_v2, %v2637_v14 }
 0x255   :  { %v2354_v15 = vadd.f32 %v2342_v45, %v2025_v12 }
 0x256   :  { %v2265_v17 = vpop.f32.mrf.mxu2 }
 0x257   :  { %v2594_v18 = vpop.f32.mrf.mxu3  ;;  %v2683_v19 = vadd.f32 %v2671_v11, %v2354_v15  ;;  %v1609_v20 = vpop.f32.mrf.mxu0  ;;  %v2266_v49 = vadd.f32 %v4540_v38, %v2265_v17 }
 0x258   :  { %v1938_v48 = vpop.f32.mrf.mxu1  ;;  %v1610_v30 = vadd.f32 %v4540_v38, %v1609_v20  ;;  %v2595_v27 = vadd.f32 %v4540_v38, %v2594_v18 }
 0x259   :  { %v2735_v21 = vrot.slane %v2683_v19, 4  ;;  %v1939_v39 = vadd.f32 %v4540_v38, %v1938_v48  ;;  %v2309_v5 = vmax.f32 %v2266_v49, 0.0 }
 0x25a   :  { %v1652_v35 = vmax.f32 %v1610_v30, 0.0  ;;  %v2638_v12 = vmax.f32 %v2595_v27, 0.0 }
 0x25b   :  { %v2736_v56 = vadd.f32 %v2735_v21, %v2683_v19  ;;  %v1981_v52 = vmax.f32 %v1939_v39, 0.0 }
 0x25c   :  { %v1685_v51 = vadd.f32 %v1652_v35, %v1651_v40 }
 0x25d   :  { %v2737_v23 = vrot.slane %v2736_v56, 2  ;;  %v2014_v6 = vadd.f32 %v1981_v52, %v1980_v47 }
 0x25e   :  { %v2267_v44 = vpop.f32.mrf.mxu2 }
 0x25f   :  { %v2596_v25 = vpop.f32.mrf.mxu3  ;;  %v2738_v26 = vadd.f32 %v2737_v23, %v2736_v56  ;;  %v1612_v28 = vpop.f32.mrf.mxu0  ;;  %v2268_v41 = vadd.f32 %v4540_v38, %v2267_v44 }
 0x260   :  { %v1941_v29 = vpop.f32.mrf.mxu1  ;;  %v1613_v33 = vadd.f32 %v4540_v38, %v1612_v28  ;;  %v2597_v53 = vadd.f32 %v4540_v38, %v2596_v25 }
 0x261   :  { %v2739_v31 = vrot.slane %v2738_v26, 1  ;;  %v1942_v1 = vadd.f32 %v4540_v38, %v1941_v29  ;;  %v2310_v60 = vmax.f32 %v2268_v41, 0.0 }
 0x262   :  { %v1653_v42 = vmax.f32 %v1613_v33, 0.0  ;;  %v2639_v7 = vmax.f32 %v2597_v53, 0.0 }
 0x263   :  { %v2740_v36 = vadd.f32 %v2739_v31, %v2738_v26  ;;  %v1982_v2 = vmax.f32 %v1942_v1, 0.0  ;;  %v2343_v13 = vadd.f32 %v2310_v60, %v2309_v5 }
 0x264   :  { %v1686_v0 = vadd.f32 %v1685_v51, %v1653_v42  ;;  %v2672_v48 = vadd.f32 %v2639_v7, %v2638_v12 }
 0x265   :  { %v2758_v62 = vmul.f32 0.00390625, %v2740_v36  ;;  %v2015_v14 = vadd.f32 %v2014_v6, %v1982_v2 }
 0x266   :  { %v2270_v43 = vpop.f32.mrf.mxu2 }
 0x267   :  { %v2599_v24 = vpop.f32.mrf.mxu3  ;;  %v2766_v46 = vpack.c.bf16 %v2758_v62, %v2758_v62  ;;  %v1614_v22 = vpop.f32.mrf.mxu0  ;;  %v2271_v57 = vadd.f32 %v4540_v38, %v2270_v43 }
 0x268   :  { %v1943_v50 = vpop.f32.mrf.mxu1  ;;  %v1615_v54 = vadd.f32 %v4540_v38, %v1614_v22  ;;  %v2600_v4 = vadd.f32 %v4540_v38, %v2599_v24 }
 0x269   :  { %v2802_v55 = vunpack.c.l.b16 %v2766_v46  ;;  %v1944_v58 = vadd.f32 %v4540_v38, %v1943_v50  ;;  %v2311_v9 = vmax.f32 %v2271_v57, 0.0 }
 0x26a   :  { %v1654_v3 = vmax.f32 %v1615_v54, 0.0  ;;  %v2640_v11 = vmax.f32 %v2600_v4, 0.0 }
 0x26b   :  { %v4595_v34 = vsel %vm2813_vm6, %v2802_v55, %v4571_v61  ;;  %v1983_v10 = vmax.f32 %v1944_v58, 0.0  ;;  %v2344_v21 = vadd.f32 %v2343_v13, %v2311_v9  ;;  %v3719_v13 = vld [vmem:[%s4631_s3] sm:$0xff] }
 0x26c   :  { %v1687_v8 = vadd.f32 %v1686_v0, %v1654_v3  ;;  %v2673_v25 = vadd.f32 %v2672_v48, %v2640_v11  ;;  %2876 = vmatpush.bf16.msra.mxu0 %v3719_v13 }
 0x26d   :  { %v2016_v56 = vadd.f32 %v2015_v14, %v1983_v10 }
 0x26e   :  { %v2272_v45 = vpop.f32.mrf.mxu2  ;;  %v1697_v17 = vadd.f32 %v1687_v8, %v4278_v63 }
 0x26f   :  { %v2601_v15 = vpop.f32.mrf.mxu3  ;;  %v2273_v18 = vadd.f32 %v4540_v38, %v2272_v45  ;;  %v1617_v61 = vpop.f32.mrf.mxu0 }
 0x270   :  { %v2602_v19 = vadd.f32 %v4540_v38, %v2601_v15  ;;  %v1946_v20 = vpop.f32.mrf.mxu1  ;;  %v2026_v26 = vadd.f32 %v2016_v56, %v1697_v17  ;;  %v1618_v46 = vadd.f32 %v4540_v38, %v1617_v61 }
 0x271   :  { %v2312_v23 = vmax.f32 %v2273_v18, 0.0  ;;  %v1947_v22 = vadd.f32 %v4540_v38, %v1946_v20 }
 0x272   :  { %v2641_v44 = vmax.f32 %v2602_v19, 0.0  ;;  %v1655_v53 = vmax.f32 %v1618_v46, 0.0 }
 0x273   :  { %v2345_v28 = vadd.f32 %v2344_v21, %v2312_v23  ;;  %v1984_v60 = vmax.f32 %v1947_v22, 0.0 }
 0x274   :  { %v2674_v30 = vadd.f32 %v2673_v25, %v2641_v44 }
 0x275   :  { %v2355_v29 = vadd.f32 %v2345_v28, %v2026_v26 }
 0x276   :  { %v2275_v31 = vpop.f32.mrf.mxu2 }
 0x277   :  { %v2604_v32 = vpop.f32.mrf.mxu3  ;;  %v2684_v33 = vadd.f32 %v2674_v30, %v2355_v29  ;;  %v1619_v63 = vpop.f32.mrf.mxu0  ;;  %v2276_v0 = vadd.f32 %v4540_v38, %v2275_v31 }
 0x278   :  { %v1948_v36 = vpop.f32.mrf.mxu1  ;;  %v1620_v43 = vadd.f32 %v4540_v38, %v1619_v63  ;;  %v2605_v9 = vadd.f32 %v4540_v38, %v2604_v32 }
 0x279   :  { %v2741_v37 = vrot.slane %v2684_v33, 4  ;;  %v1949_v51 = vadd.f32 %v4540_v38, %v1948_v36  ;;  %v2313_v19 = vmax.f32 %v2276_v0, 0.0 }
 0x27a   :  { %v1656_v50 = vmax.f32 %v1620_v43, 0.0  ;;  %v2642_v23 = vmax.f32 %v2605_v9, 0.0 }
 0x27b   :  { %v2742_v35 = vadd.f32 %v2741_v37, %v2684_v33  ;;  %v1985_v5 = vmax.f32 %v1949_v51, 0.0 }
 0x27c   :  { %v1688_v4 = vadd.f32 %v1656_v50, %v1655_v53 }
 0x27d   :  { %v2743_v39 = vrot.slane %v2742_v35, 2  ;;  %v2017_v61 = vadd.f32 %v1985_v5, %v1984_v60 }
 0x27e   :  { %v2277_v62 = vpop.f32.mrf.mxu2 }
 0x27f   :  { %v2606_v40 = vpop.f32.mrf.mxu3  ;;  %v2744_v41 = vadd.f32 %v2743_v39, %v2742_v35  ;;  %v1622_v42 = vpop.f32.mrf.mxu0  ;;  %v2278_v54 = vadd.f32 %v4540_v38, %v2277_v62 }
 0x280   :  { %v1951_v1 = vpop.f32.mrf.mxu1  ;;  %v1623_v47 = vadd.f32 %v4540_v38, %v1622_v42  ;;  %v2607_v6 = vadd.f32 %v4540_v38, %v2606_v40 }
 0x281   :  { %v2745_v24 = vrot.slane %v2744_v41, 1  ;;  %v1952_v27 = vadd.f32 %v4540_v38, %v1951_v1  ;;  %v2314_v14 = vmax.f32 %v2278_v54, 0.0 }
 0x282   :  { %v1657_v55 = vmax.f32 %v1623_v47, 0.0  ;;  %v2643_v20 = vmax.f32 %v2607_v6, 0.0 }
 0x283   :  { %v2746_v49 = vadd.f32 %v2745_v24, %v2744_v41  ;;  %v1986_v15 = vmax.f32 %v1952_v27, 0.0  ;;  %v2346_v44 = vadd.f32 %v2314_v14, %v2313_v19 }
 0x284   :  { %v1689_v45 = vadd.f32 %v1688_v4, %v1657_v55  ;;  %v2675_v33 = vadd.f32 %v2643_v20, %v2642_v23 }
 0x285   :  { %v2759_v52 = vmul.f32 0.00390625, %v2746_v49  ;;  %v2018_v25 = vadd.f32 %v2017_v61, %v1986_v15 }
 0x286   :  { %v2280_v57 = vpop.f32.mrf.mxu2 }
 0x287   :  { %v2609_v58 = vpop.f32.mrf.mxu3  ;;  %v2767_v59 = vpack.c.bf16 %v2759_v52, %v2759_v52  ;;  %v1624_v2 = vpop.f32.mrf.mxu0  ;;  %v2281_v10 = vadd.f32 %v4540_v38, %v2280_v57  ;;  %v3728_v52 = vld [vmem:[%s4632_s4] ss:$0 sm:$0xff] }
 0x288   :  { %v1953_v3 = vpop.f32.mrf.mxu1  ;;  %v1625_v7 = vadd.f32 %v4540_v38, %v1624_v2  ;;  %v2610_v17 = vadd.f32 %v4540_v38, %v2609_v58 }
 0x289   :  { %v2803_v8 = vunpack.c.l.b16 %v2767_v59  ;;  %v1954_v12 = vadd.f32 %v4540_v38, %v1953_v3  ;;  %v2315_v21 = vmax.f32 %v2281_v10, 0.0 }
 0x28a   :  { %v1658_v11 = vmax.f32 %v1625_v7, 0.0  ;;  %v2644_v29 = vmax.f32 %v2610_v17, 0.0 }
 0x28b   :  { %v2816_v18 = vsel %vm2815_vm7, %v2803_v8, %v4595_v34  ;;  %v1987_v56 = vmax.f32 %v1954_v12, 0.0  ;;  %v2347_v34 = vadd.f32 %v2346_v44, %v2315_v21 }
 0x28c   :  { %v1690_v48 = vadd.f32 %v1689_v45, %v1658_v11  ;;  %v2676_v35 = vadd.f32 %v2675_v33, %v2644_v29 }
 0x28d   :  { %v2019_v63 = vadd.f32 %v2018_v25, %v1987_v56 }
 0x28e   :  { %v2282_v26 = vpop.f32.mrf.mxu2  ;;  %v1698_v30 = vadd.f32 %v1690_v48, %v4328_v16 }
 0x28f   :  { %v2611_v28 = vpop.f32.mrf.mxu3  ;;  %v2283_v31 = vadd.f32 %v4540_v38, %v2282_v26 }
 0x290   :  { %v2612_v32 = vadd.f32 %v4540_v38, %v2611_v28  ;;  %v2027_v39 = vadd.f32 %v2019_v63, %v1698_v30 }
 0x291   :  { %v2316_v36 = vmax.f32 %v2283_v31, 0.0 }
 0x292   :  { %v2645_v37 = vmax.f32 %v2612_v32, 0.0 }
 0x293   :  { %v2348_v62 = vadd.f32 %v2347_v34, %v2316_v36 }
 0x294   :  { %v2677_v41 = vadd.f32 %v2676_v35, %v2645_v37 }
 0x295   :  { %v2356_v40 = vadd.f32 %v2348_v62, %v2027_v39 }
 0x297   :  { %v2685_v42 = vadd.f32 %v2677_v41, %v2356_v40 }
 0x299   :  { %v2747_v1 = vrot.slane %v2685_v42, 4 }
 0x29b   :  { %v2748_v43 = vadd.f32 %v2747_v1, %v2685_v42 }
 0x29d   :  { %v2749_v24 = vrot.slane %v2748_v43, 2 }
 0x29f   :  { %v2750_v46 = vadd.f32 %v2749_v24, %v2748_v43 }
 0x2a1   :  { %v2751_v16 = vrot.slane %v2750_v46, 1 }
 0x2a3   :  { %v2752_v47 = vadd.f32 %v2751_v16, %v2750_v46 }
 0x2a5   :  { %v2760_v49 = vmul.f32 0.00390625, %v2752_v47 }
 0x2a7   :  { %v2768_v22 = vpack.c.bf16 %v2760_v49, %v2760_v49 }
 0x2a9   :  { %v2804_v38 = vunpack.c.l.b16 %v2768_v22 }
 0x2ab   :  { %v2818_v50 = vsel %vm2817_vm8, %v2804_v38, %v2816_v18 }
 0x2ac   :  { %v2819_v51 = vpack.c.b16 %v2818_v50, %v2818_v50 }
 0x2ae   :  { %2877 = vmatmul.bf16.vlgmr.msra.gmra.mxu0 %v2819_v51 }
 0x32b   :  { %v2878_v53 = vpop.f32.mrf.mxu0 }
 0x32c   :  { %v2879_v54 = vadd.f32 %v3728_v52, %v2878_v53 }
 0x32e   :  { %2882 = vmax.xlane.f32.xlu0 %v2879_v54 }
 0x333   :  { %v2880_v55 = vpop.f32.mrf.mxu0 }
 0x3a1   :  { %v2883_v27 = vpop.xlane.xlu0 %2882 }
 0x3a2   :  { %v2884_v57 = vsub.f32 %v2879_v54, %v2883_v27 }
 0x3a4   :  { %v2885_v58 = vmul.f32 1.442695, %v2884_v57 }
 0x3a6   :  { %3729 = vpow2.f32 %v2885_v58 }
 0x3ac   :  { %v3730_v59 = vpop.eup %3729 }
 0x3ad   :  { %2887 = vadd.xlane.f32.xlu0 %v3730_v59 }
 0x420   :  { %v2888_v60 = vpop.xlane.xlu0 %2887 }
 0x421   :  { %3731 = vrcp.f32 %v2888_v60  ;;  %v2900_v4 = vand.u32 2147483648, %v2888_v60  ;;  %v2898_v6 = vand.u32 2147483647, %v2888_v60  ;;  %vm2894_vm10 = vweird.f32 %v2888_v60 }
 0x423   :  { %v2901_v8 = vor.u32 1.1754944e-38, %v2900_v4  ;;  %vm2899_vm12 = vcmp.eq.f32.partialorder %v2898_v6, 8.507059e+37 }
 0x427   :  { %v3732_v0 = vpop.eup %3731 }
 0x428   :  { %v2890_v2 = vmul.f32 %v3732_v0, %v2888_v60  ;;  %vm2895_vm9 = vweird.f32 %v3732_v0 }
 0x429   :  { %vm2896_vm11 = vmor %vm2894_vm10, %vm2895_vm9 }
 0x42a   :  { %v2891_v3 = vsub.f32 1.0, %v2890_v2 }
 0x42c   :  { %v2892_v5 = vmul.f32 %v3732_v0, %v2891_v3 }
 0x42e   :  { %v2893_v7 = vadd.f32 %v3732_v0, %v2892_v5 }
 0x430   :  { %v2897_v9 = vsel %vm2896_vm11, %v3732_v0, %v2893_v7 }
 0x431   :  { %v2902_v10 = vsel %vm2899_vm12, %v2901_v8, %v2897_v9 }
 0x432   :  { %v2903_v12 = vmul.f32 %v3730_v59, %v2902_v10 }
 0x434   :  { %2904 = vst [vmem:[%s4633_s5] sm:$0xff] %v2903_v12 }

</bundles_post_ra>
